<compile_context>
chip_gen: v5e
topology: v5e:2x2
jax: 0.10.0
libtpu: 0.0.40
codegen_flags: <defaults>
</compile_context>

<pallas_src>
import functools

import jax
import jax.numpy as jnp
from jax import lax
from jax.experimental import pallas as pl
from jax.experimental.pallas import tpu as pltpu

_LANE = 128
_EPS = 1e-5


def _round_up(x, m):
    return (x + m - 1) // m * m


def _mlp_block_t(x, w, b, gamma, beta, inv_n):
    """Linear -> LayerNorm(eps=1e-5) -> ELU(alpha=1) in (features, batch) layout.

    x: (in_p, Bt)   w: (out_p, in_p)   b/gamma/beta: (out_p, 1)
    inv_n = 1 / real_hidden_dim.  The E[y^2] - mu^2 variance form is used on
    purpose: padded feature rows of y are exactly zero (and gamma/beta are
    zero-padded), so sums over the padded feature axis are exact.
    """
    y = jnp.dot(w, x, preferred_element_type=jnp.float32) + b      # MXU
    mu = jnp.sum(y, axis=0, keepdims=True) * inv_n                  # (1, Bt)
    ms = jnp.sum(y * y, axis=0, keepdims=True) * inv_n              # E[y^2]
    var = ms - mu * mu                                              # biased var
    scale = gamma * lax.rsqrt(var + _EPS)                           # (out_p, Bt)
    shift = beta - mu * scale
    yn = y * scale + shift
    # ELU; exp only on the clamped branch (no inf / NaN-grad hazard).
    return jnp.where(yn > 0, yn, jnp.exp(jnp.minimum(yn, 0.0)) - 1.0)


def qnet_kernel(v_ref,
                w1_ref, b1_ref, g1_ref, be1_ref,
                w2_ref, b2_ref, g2_ref, be2_ref,
                w3_ref, b3_ref, g3_ref, be3_ref,
                wg_ref, bg_ref, mg_ref,
                o_ref, *, inv_hdim):
    v = v_ref[...]                                                  # (vdim_p, Bt)

    h = _mlp_block_t(v, w1_ref[...], b1_ref[...], g1_ref[...], be1_ref[...], inv_hdim)
    h = h + _mlp_block_t(h, w2_ref[...], b2_ref[...], g2_ref[...], be2_ref[...], inv_hdim)
    h = h + _mlp_block_t(h, w3_ref[...], b3_ref[...], g3_ref[...], be3_ref[...], inv_hdim)

    # bmm(out.unsqueeze(1), W[ilist]) + b[ilist]  ==  per-sample dot with the
    # gathered head column; batch on lanes -> lane-dense (1, Bt) result.
    head = jnp.sum(h * wg_ref[...], axis=0, keepdims=True) + bg_ref[...]

    # where(|V|.sum(-1) == 0, marginals[ilist], head)   (exact-zero check,
    # matching the torch semantics; padded rows/cols of V are exact zeros)
    is_zero = jnp.sum(jnp.abs(v), axis=0, keepdims=True) == 0.0
    o_ref[...] = jnp.where(is_zero, mg_ref[...], head)


def _pick_b_tile(B_p):
    # Largest batch tile (lane axis) that divides the 128-padded batch.
    # Bigger tiles amortize the ~0.35us per-grid-step overhead; 512 keeps
    # the streamed V^T / W[ilist]^T double-buffers comfortably inside VMEM.
    for t in (512, 256, 128):
        if B_p % t == 0:
            return t
    return _LANE


def qnet_forward(V, ilist, params, *, b_tile=None):
    """V: (B, vdim) f32, ilist: (B,) int32 into head_indim  ->  (B, 1) f32."""
    B, vdim = V.shape
    hdim = params["w1"].shape[0]                  # weights stored torch-style (out, in)

    vdim_p = _round_up(vdim, _LANE)
    hdim_p = _round_up(hdim, _LANE)
    B_p = _round_up(B, _LANE)
    if b_tile is None:
        b_tile = _pick_b_tile(B_p)
    assert b_tile % _LANE == 0 and B_p % b_tile == 0
    n_tiles = B_p // b_tile

    def pad2(a, r, c):
        return jnp.pad(a, ((0, r - a.shape[0]), (0, c - a.shape[1])))

    def col(vec, r):
        return jnp.pad(vec, (0, r - vec.shape[0])).reshape(r, 1)

    # ---- layout glue (pure plumbing): batch on lanes, features padded to 128 ----
    Vt = pad2(V, B_p, vdim_p).T                                     # (vdim_p, B_p)

    w1p = pad2(params["w1"], hdim_p, vdim_p)
    w2p = pad2(params["w2"], hdim_p, hdim_p)
    w3p = pad2(params["w3"], hdim_p, hdim_p)
    b1p, g1p, be1p = (col(params[k], hdim_p) for k in ("b1", "g1", "be1"))
    b2p, g2p, be2p = (col(params[k], hdim_p) for k in ("b2", "g2", "be2"))
    b3p, g3p, be3p = (col(params[k], hdim_p) for k in ("b3", "g3", "be3"))

    # Per-sample head params, gathered once and streamed with the batch grid.
    ilist_p = jnp.pad(ilist, (0, B_p - B))
    WgT = pad2(params["W"][ilist_p, :, 0].T, hdim_p, B_p)           # (hdim_p, B_p)
    bg = params["b"][ilist_p, 0, 0].reshape(1, B_p)                 # (1, B_p)
    mg = params["marginals"][ilist_p, 0].reshape(1, B_p)            # (1, B_p)

    batch_col = lambda i: (0, i)     # tiles that move along the batch grid
    resident = lambda i: (0, 0)      # weights: DMA'd once, stay resident in VMEM

    vec_spec = pl.BlockSpec((hdim_p, 1), resident)

    out = pl.pallas_call(
        functools.partial(qnet_kernel, inv_hdim=1.0 / float(hdim)),
        out_shape=jax.ShapeDtypeStruct((1, B_p), jnp.float32),
        grid_spec=pltpu.PrefetchScalarGridSpec(
            num_scalar_prefetch=0,
            grid=(n_tiles,),
            in_specs=[
                pl.BlockSpec((vdim_p, b_tile), batch_col),                    # V^T
                pl.BlockSpec((hdim_p, vdim_p), resident), vec_spec, vec_spec, vec_spec,
                pl.BlockSpec((hdim_p, hdim_p), resident), vec_spec, vec_spec, vec_spec,
                pl.BlockSpec((hdim_p, hdim_p), resident), vec_spec, vec_spec, vec_spec,
                pl.BlockSpec((hdim_p, b_tile), batch_col),                    # W[ilist]^T
                pl.BlockSpec((1, b_tile), batch_col),                         # b[ilist]
                pl.BlockSpec((1, b_tile), batch_col),                         # marginals[ilist]
            ],
            out_specs=pl.BlockSpec((1, b_tile), batch_col),
        ),
        compiler_params=pltpu.CompilerParams(
            dimension_semantics=("parallel",),          # megacore sharding on v7x
            vmem_limit_bytes=32 * 1024 * 1024,          # explicit; fits v5e/v6e/v7x
        ),
    )(Vt, w1p, b1p, g1p, be1p, w2p, b2p, g2p, be2p, w3p, b3p, g3p, be3p,
      WgT, bg, mg)

    return out[0, :B].reshape(B, 1)


def init_params(key, vdim, hdim, flow=False):
    """Deterministic synthetic init matching Qnet.__init__ (torch layouts: W is (out, in))."""
    head_indim = vdim + 1 if flow else vdim
    ks = jax.random.split(key, 4)

    def lin(k, fan_in, fan_out):
        bound = 1.0 / jnp.sqrt(jnp.float32(fan_in))
        kw, kb = jax.random.split(k)
        w = jax.random.uniform(kw, (fan_out, fan_in), jnp.float32, -bound, bound)
        b = jax.random.uniform(kb, (fan_out,), jnp.float32, -bound, bound)
        return w, b

    w1, b1 = lin(ks[0], vdim, hdim)
    w2, b2 = lin(ks[1], hdim, hdim)
    w3, b3 = lin(ks[2], hdim, hdim)
    ones = jnp.ones((hdim,), jnp.float32)
    zeros = jnp.zeros((hdim,), jnp.float32)

    W = 0.01 * jax.random.normal(ks[3], (head_indim, hdim, 1), jnp.float32)
    b = jnp.zeros((head_indim, 1, 1), jnp.float32)
    marginals = jnp.zeros((head_indim, 1), jnp.float32)

    return dict(w1=w1, b1=b1, g1=ones, be1=zeros,
                w2=w2, b2=b2, g2=ones, be2=zeros,
                w3=w3, b3=b3, g3=ones, be3=zeros,
                W=W, b=b, marginals=marginals)


def qnet_reference(V, ilist, params):
    """Plain-JAX mirror of the torch forward, for correctness checking."""
    def block(x, w, b, g, be):
        y = x @ w.T + b
        mu = jnp.mean(y, axis=-1, keepdims=True)
        var = jnp.mean((y - mu) ** 2, axis=-1, keepdims=True)
        yn = (y - mu) / jnp.sqrt(var + _EPS) * g + be
        return jnp.where(yn > 0, yn, jnp.exp(jnp.minimum(yn, 0.0)) - 1.0)

    h = block(V, params["w1"], params["b1"], params["g1"], params["be1"])
    h = h + block(h, params["w2"], params["b2"], params["g2"], params["be2"])
    h = h + block(h, params["w3"], params["b3"], params["g3"], params["be3"])
    out = jnp.sum(h * params["W"][ilist, :, 0], axis=-1, keepdims=True) + params["b"][ilist, 0, :]
    is_zero = jnp.sum(jnp.abs(V), axis=-1, keepdims=True) == 0.0
    return jnp.where(is_zero, params["marginals"][ilist], out)


if __name__ == "__main__":
    vdim, hdim, B = 16, 32, 8
    key = jax.random.PRNGKey(0)
    kp, kv, ki = jax.random.split(key, 3)

    params = init_params(kp, vdim, hdim, flow=False)

    V = jax.random.normal(kv, (B, vdim), jnp.float32)
    V = V.at[0].set(0.0)                 # exercise the all-zero-row -> marginals branch
    ilist = jax.random.randint(ki, (B,), 0, vdim, dtype=jnp.int32)

    fwd = jax.jit(qnet_forward)
    out = fwd(V, ilist, params)
    jax.block_until_ready(out)

    ref = qnet_reference(V, ilist, params)
    assert out.shape == (B, 1) and out.dtype == jnp.float32
    # Tolerance covers TPU default f32 matmul precision / accumulation-order
    # differences between the MXU kernel and the XLA reference.
    assert jnp.allclose(out, ref, atol=2e-3, rtol=2e-3), (out, ref)
    print("KERNEL_OK")
</pallas_src>

<mosaic_0001>
module attributes {stable_mosaic.version = 11 : i64} {
  func.func @qnet_kernel(%arg0: i32, %arg1: memref<128x128xf32, #tpu.memory_space<vmem>>, %arg2: memref<128x128xf32, #tpu.memory_space<vmem>>, %arg3: memref<128x1xf32, #tpu.memory_space<vmem>>, %arg4: memref<128x1xf32, #tpu.memory_space<vmem>>, %arg5: memref<128x1xf32, #tpu.memory_space<vmem>>, %arg6: memref<128x128xf32, #tpu.memory_space<vmem>>, %arg7: memref<128x1xf32, #tpu.memory_space<vmem>>, %arg8: memref<128x1xf32, #tpu.memory_space<vmem>>, %arg9: memref<128x1xf32, #tpu.memory_space<vmem>>, %arg10: memref<128x128xf32, #tpu.memory_space<vmem>>, %arg11: memref<128x1xf32, #tpu.memory_space<vmem>>, %arg12: memref<128x1xf32, #tpu.memory_space<vmem>>, %arg13: memref<128x1xf32, #tpu.memory_space<vmem>>, %arg14: memref<128x128xf32, #tpu.memory_space<vmem>>, %arg15: memref<1x128xf32, #tpu.memory_space<vmem>>, %arg16: memref<1x128xf32, #tpu.memory_space<vmem>>, %arg17: memref<1x128xf32, #tpu.memory_space<vmem>>) attributes {dimension_semantics = [#tpu.dimension_semantics<parallel>], iteration_bounds = array<i64: 1>, scalar_prefetch = 0 : i64, scratch_operands = 0 : i64, tpu.core_type = #tpu.core_type<tc>, window_params = [{transform_indices = @transform_0, window_bounds = array<i64: 128, 128>}, {pipeline_mode = #tpu.pipeline_mode<synchronous>, transform_indices = @transform_1, window_bounds = array<i64: 128, 128>}, {pipeline_mode = #tpu.pipeline_mode<synchronous>, transform_indices = @transform_2, window_bounds = array<i64: 128, 1>}, {pipeline_mode = #tpu.pipeline_mode<synchronous>, transform_indices = @transform_3, window_bounds = array<i64: 128, 1>}, {pipeline_mode = #tpu.pipeline_mode<synchronous>, transform_indices = @transform_4, window_bounds = array<i64: 128, 1>}, {pipeline_mode = #tpu.pipeline_mode<synchronous>, transform_indices = @transform_5, window_bounds = array<i64: 128, 128>}, {pipeline_mode = #tpu.pipeline_mode<synchronous>, transform_indices = @transform_6, window_bounds = array<i64: 128, 1>}, {pipeline_mode = #tpu.pipeline_mode<synchronous>, transform_indices = @transform_7, window_bounds = array<i64: 128, 1>}, {pipeline_mode = #tpu.pipeline_mode<synchronous>, transform_indices = @transform_8, window_bounds = array<i64: 128, 1>}, {pipeline_mode = #tpu.pipeline_mode<synchronous>, transform_indices = @transform_9, window_bounds = array<i64: 128, 128>}, {pipeline_mode = #tpu.pipeline_mode<synchronous>, transform_indices = @transform_10, window_bounds = array<i64: 128, 1>}, {pipeline_mode = #tpu.pipeline_mode<synchronous>, transform_indices = @transform_11, window_bounds = array<i64: 128, 1>}, {pipeline_mode = #tpu.pipeline_mode<synchronous>, transform_indices = @transform_12, window_bounds = array<i64: 128, 1>}, {transform_indices = @transform_13, window_bounds = array<i64: 128, 128>}, {transform_indices = @transform_14, window_bounds = array<i64: 1, 128>}, {transform_indices = @transform_15, window_bounds = array<i64: 1, 128>}, {transform_indices = @transform_16, window_bounds = array<i64: 1, 128>}]} {
    %c0 = arith.constant 0 : index
    %c0_0 = arith.constant 0 : index
    %0 = vector.load %arg1[%c0, %c0_0] : memref<128x128xf32, #tpu.memory_space<vmem>>, vector<128x128xf32>
    %c0_1 = arith.constant 0 : index
    %c0_2 = arith.constant 0 : index
    %1 = vector.load %arg2[%c0_1, %c0_2] : memref<128x128xf32, #tpu.memory_space<vmem>>, vector<128x128xf32>
    %c0_3 = arith.constant 0 : index
    %c0_4 = arith.constant 0 : index
    %2 = vector.load %arg3[%c0_3, %c0_4] : memref<128x1xf32, #tpu.memory_space<vmem>>, vector<128x1xf32>
    %c0_5 = arith.constant 0 : index
    %c0_6 = arith.constant 0 : index
    %3 = vector.load %arg4[%c0_5, %c0_6] : memref<128x1xf32, #tpu.memory_space<vmem>>, vector<128x1xf32>
    %c0_7 = arith.constant 0 : index
    %c0_8 = arith.constant 0 : index
    %4 = vector.load %arg5[%c0_7, %c0_8] : memref<128x1xf32, #tpu.memory_space<vmem>>, vector<128x1xf32>
    %cst = arith.constant dense<0.000000e+00> : vector<128x128xf32>
    %5 = tpu.matmul %1, %0, %cst {dimension_numbers = #tpu.dot_dimension_numbers<[1], [0], [0], [1], [0, 0, 1, 1], [], []>} : vector<128x128xf32>, vector<128x128xf32>, vector<128x128xf32> -> vector<128x128xf32>
    %6 = vector.broadcast %2 : vector<128x1xf32> to vector<128x128xf32>
    %7 = arith.addf %5, %6 : vector<128x128xf32>
    %cst_9 = arith.constant dense<0.000000e+00> : vector<128xf32>
    %8 = vector.multi_reduction <add>, %7, %cst_9 [0] : vector<128x128xf32> to vector<128xf32>
    %9 = vector.shape_cast %8 : vector<128xf32> to vector<1x128xf32>
    %cst_10 = arith.constant 3.125000e-02 : f32
    %10 = vector.broadcast %cst_10 : f32 to vector<1x128xf32>
    %11 = arith.mulf %9, %10 : vector<1x128xf32>
    %12 = arith.mulf %7, %7 : vector<128x128xf32>
    %cst_11 = arith.constant dense<0.000000e+00> : vector<128xf32>
    %13 = vector.multi_reduction <add>, %12, %cst_11 [0] : vector<128x128xf32> to vector<128xf32>
    %14 = vector.shape_cast %13 : vector<128xf32> to vector<1x128xf32>
    %cst_12 = arith.constant 3.125000e-02 : f32
    %15 = vector.broadcast %cst_12 : f32 to vector<1x128xf32>
    %16 = arith.mulf %14, %15 : vector<1x128xf32>
    %17 = arith.mulf %11, %11 : vector<1x128xf32>
    %18 = arith.subf %16, %17 : vector<1x128xf32>
    %cst_13 = arith.constant 9.99999974E-6 : f32
    %19 = vector.broadcast %cst_13 : f32 to vector<1x128xf32>
    %20 = arith.addf %18, %19 : vector<1x128xf32>
    %21 = math.rsqrt %20 : vector<1x128xf32>
    %22 = vector.broadcast %3 : vector<128x1xf32> to vector<128x128xf32>
    %23 = vector.broadcast %21 : vector<1x128xf32> to vector<128x128xf32>
    %24 = arith.mulf %22, %23 : vector<128x128xf32>
    %25 = vector.broadcast %11 : vector<1x128xf32> to vector<128x128xf32>
    %26 = arith.mulf %25, %24 : vector<128x128xf32>
    %27 = vector.broadcast %4 : vector<128x1xf32> to vector<128x128xf32>
    %28 = arith.subf %27, %26 : vector<128x128xf32>
    %29 = arith.mulf %7, %24 : vector<128x128xf32>
    %30 = arith.addf %29, %28 : vector<128x128xf32>
    %cst_14 = arith.constant 0.000000e+00 : f32
    %31 = vector.broadcast %cst_14 : f32 to vector<128x128xf32>
    %32 = arith.cmpf ogt, %30, %31 : vector<128x128xf32>
    %cst_15 = arith.constant 0.000000e+00 : f32
    %33 = vector.broadcast %cst_15 : f32 to vector<128x128xf32>
    %34 = arith.minimumf %30, %33 : vector<128x128xf32>
    %35 = math.exp %34 : vector<128x128xf32>
    %cst_16 = arith.constant 1.000000e+00 : f32
    %36 = vector.broadcast %cst_16 : f32 to vector<128x128xf32>
    %37 = arith.subf %35, %36 : vector<128x128xf32>
    %38 = arith.select %32, %30, %37 : vector<128x128xi1>, vector<128x128xf32>
    %c0_17 = arith.constant 0 : index
    %c0_18 = arith.constant 0 : index
    %39 = vector.load %arg6[%c0_17, %c0_18] : memref<128x128xf32, #tpu.memory_space<vmem>>, vector<128x128xf32>
    %c0_19 = arith.constant 0 : index
    %c0_20 = arith.constant 0 : index
    %40 = vector.load %arg7[%c0_19, %c0_20] : memref<128x1xf32, #tpu.memory_space<vmem>>, vector<128x1xf32>
    %c0_21 = arith.constant 0 : index
    %c0_22 = arith.constant 0 : index
    %41 = vector.load %arg8[%c0_21, %c0_22] : memref<128x1xf32, #tpu.memory_space<vmem>>, vector<128x1xf32>
    %c0_23 = arith.constant 0 : index
    %c0_24 = arith.constant 0 : index
    %42 = vector.load %arg9[%c0_23, %c0_24] : memref<128x1xf32, #tpu.memory_space<vmem>>, vector<128x1xf32>
    %cst_25 = arith.constant dense<0.000000e+00> : vector<128x128xf32>
    %43 = tpu.matmul %39, %38, %cst_25 {dimension_numbers = #tpu.dot_dimension_numbers<[1], [0], [0], [1], [0, 0, 1, 1], [], []>} : vector<128x128xf32>, vector<128x128xf32>, vector<128x128xf32> -> vector<128x128xf32>
    %44 = vector.broadcast %40 : vector<128x1xf32> to vector<128x128xf32>
    %45 = arith.addf %43, %44 : vector<128x128xf32>
    %cst_26 = arith.constant dense<0.000000e+00> : vector<128xf32>
    %46 = vector.multi_reduction <add>, %45, %cst_26 [0] : vector<128x128xf32> to vector<128xf32>
    %47 = vector.shape_cast %46 : vector<128xf32> to vector<1x128xf32>
    %cst_27 = arith.constant 3.125000e-02 : f32
    %48 = vector.broadcast %cst_27 : f32 to vector<1x128xf32>
    %49 = arith.mulf %47, %48 : vector<1x128xf32>
    %50 = arith.mulf %45, %45 : vector<128x128xf32>
    %cst_28 = arith.constant dense<0.000000e+00> : vector<128xf32>
    %51 = vector.multi_reduction <add>, %50, %cst_28 [0] : vector<128x128xf32> to vector<128xf32>
    %52 = vector.shape_cast %51 : vector<128xf32> to vector<1x128xf32>
    %cst_29 = arith.constant 3.125000e-02 : f32
    %53 = vector.broadcast %cst_29 : f32 to vector<1x128xf32>
    %54 = arith.mulf %52, %53 : vector<1x128xf32>
    %55 = arith.mulf %49, %49 : vector<1x128xf32>
    %56 = arith.subf %54, %55 : vector<1x128xf32>
    %cst_30 = arith.constant 9.99999974E-6 : f32
    %57 = vector.broadcast %cst_30 : f32 to vector<1x128xf32>
    %58 = arith.addf %56, %57 : vector<1x128xf32>
    %59 = math.rsqrt %58 : vector<1x128xf32>
    %60 = vector.broadcast %41 : vector<128x1xf32> to vector<128x128xf32>
    %61 = vector.broadcast %59 : vector<1x128xf32> to vector<128x128xf32>
    %62 = arith.mulf %60, %61 : vector<128x128xf32>
    %63 = vector.broadcast %49 : vector<1x128xf32> to vector<128x128xf32>
    %64 = arith.mulf %63, %62 : vector<128x128xf32>
    %65 = vector.broadcast %42 : vector<128x1xf32> to vector<128x128xf32>
    %66 = arith.subf %65, %64 : vector<128x128xf32>
    %67 = arith.mulf %45, %62 : vector<128x128xf32>
    %68 = arith.addf %67, %66 : vector<128x128xf32>
    %cst_31 = arith.constant 0.000000e+00 : f32
    %69 = vector.broadcast %cst_31 : f32 to vector<128x128xf32>
    %70 = arith.cmpf ogt, %68, %69 : vector<128x128xf32>
    %cst_32 = arith.constant 0.000000e+00 : f32
    %71 = vector.broadcast %cst_32 : f32 to vector<128x128xf32>
    %72 = arith.minimumf %68, %71 : vector<128x128xf32>
    %73 = math.exp %72 : vector<128x128xf32>
    %cst_33 = arith.constant 1.000000e+00 : f32
    %74 = vector.broadcast %cst_33 : f32 to vector<128x128xf32>
    %75 = arith.subf %73, %74 : vector<128x128xf32>
    %76 = arith.select %70, %68, %75 : vector<128x128xi1>, vector<128x128xf32>
    %77 = arith.addf %38, %76 : vector<128x128xf32>
    %c0_34 = arith.constant 0 : index
    %c0_35 = arith.constant 0 : index
    %78 = vector.load %arg10[%c0_34, %c0_35] : memref<128x128xf32, #tpu.memory_space<vmem>>, vector<128x128xf32>
    %c0_36 = arith.constant 0 : index
    %c0_37 = arith.constant 0 : index
    %79 = vector.load %arg11[%c0_36, %c0_37] : memref<128x1xf32, #tpu.memory_space<vmem>>, vector<128x1xf32>
    %c0_38 = arith.constant 0 : index
    %c0_39 = arith.constant 0 : index
    %80 = vector.load %arg12[%c0_38, %c0_39] : memref<128x1xf32, #tpu.memory_space<vmem>>, vector<128x1xf32>
    %c0_40 = arith.constant 0 : index
    %c0_41 = arith.constant 0 : index
    %81 = vector.load %arg13[%c0_40, %c0_41] : memref<128x1xf32, #tpu.memory_space<vmem>>, vector<128x1xf32>
    %cst_42 = arith.constant dense<0.000000e+00> : vector<128x128xf32>
    %82 = tpu.matmul %78, %77, %cst_42 {dimension_numbers = #tpu.dot_dimension_numbers<[1], [0], [0], [1], [0, 0, 1, 1], [], []>} : vector<128x128xf32>, vector<128x128xf32>, vector<128x128xf32> -> vector<128x128xf32>
    %83 = vector.broadcast %79 : vector<128x1xf32> to vector<128x128xf32>
    %84 = arith.addf %82, %83 : vector<128x128xf32>
    %cst_43 = arith.constant dense<0.000000e+00> : vector<128xf32>
    %85 = vector.multi_reduction <add>, %84, %cst_43 [0] : vector<128x128xf32> to vector<128xf32>
    %86 = vector.shape_cast %85 : vector<128xf32> to vector<1x128xf32>
    %cst_44 = arith.constant 3.125000e-02 : f32
    %87 = vector.broadcast %cst_44 : f32 to vector<1x128xf32>
    %88 = arith.mulf %86, %87 : vector<1x128xf32>
    %89 = arith.mulf %84, %84 : vector<128x128xf32>
    %cst_45 = arith.constant dense<0.000000e+00> : vector<128xf32>
    %90 = vector.multi_reduction <add>, %89, %cst_45 [0] : vector<128x128xf32> to vector<128xf32>
    %91 = vector.shape_cast %90 : vector<128xf32> to vector<1x128xf32>
    %cst_46 = arith.constant 3.125000e-02 : f32
    %92 = vector.broadcast %cst_46 : f32 to vector<1x128xf32>
    %93 = arith.mulf %91, %92 : vector<1x128xf32>
    %94 = arith.mulf %88, %88 : vector<1x128xf32>
    %95 = arith.subf %93, %94 : vector<1x128xf32>
    %cst_47 = arith.constant 9.99999974E-6 : f32
    %96 = vector.broadcast %cst_47 : f32 to vector<1x128xf32>
    %97 = arith.addf %95, %96 : vector<1x128xf32>
    %98 = math.rsqrt %97 : vector<1x128xf32>
    %99 = vector.broadcast %80 : vector<128x1xf32> to vector<128x128xf32>
    %100 = vector.broadcast %98 : vector<1x128xf32> to vector<128x128xf32>
    %101 = arith.mulf %99, %100 : vector<128x128xf32>
    %102 = vector.broadcast %88 : vector<1x128xf32> to vector<128x128xf32>
    %103 = arith.mulf %102, %101 : vector<128x128xf32>
    %104 = vector.broadcast %81 : vector<128x1xf32> to vector<128x128xf32>
    %105 = arith.subf %104, %103 : vector<128x128xf32>
    %106 = arith.mulf %84, %101 : vector<128x128xf32>
    %107 = arith.addf %106, %105 : vector<128x128xf32>
    %cst_48 = arith.constant 0.000000e+00 : f32
    %108 = vector.broadcast %cst_48 : f32 to vector<128x128xf32>
    %109 = arith.cmpf ogt, %107, %108 : vector<128x128xf32>
    %cst_49 = arith.constant 0.000000e+00 : f32
    %110 = vector.broadcast %cst_49 : f32 to vector<128x128xf32>
    %111 = arith.minimumf %107, %110 : vector<128x128xf32>
    %112 = math.exp %111 : vector<128x128xf32>
    %cst_50 = arith.constant 1.000000e+00 : f32
    %113 = vector.broadcast %cst_50 : f32 to vector<128x128xf32>
    %114 = arith.subf %112, %113 : vector<128x128xf32>
    %115 = arith.select %109, %107, %114 : vector<128x128xi1>, vector<128x128xf32>
    %116 = arith.addf %77, %115 : vector<128x128xf32>
    %c0_51 = arith.constant 0 : index
    %c0_52 = arith.constant 0 : index
    %117 = vector.load %arg14[%c0_51, %c0_52] : memref<128x128xf32, #tpu.memory_space<vmem>>, vector<128x128xf32>
    %118 = arith.mulf %116, %117 : vector<128x128xf32>
    %cst_53 = arith.constant dense<0.000000e+00> : vector<128xf32>
    %119 = vector.multi_reduction <add>, %118, %cst_53 [0] : vector<128x128xf32> to vector<128xf32>
    %120 = vector.shape_cast %119 : vector<128xf32> to vector<1x128xf32>
    %c0_54 = arith.constant 0 : index
    %c0_55 = arith.constant 0 : index
    %121 = vector.load %arg15[%c0_54, %c0_55] : memref<1x128xf32, #tpu.memory_space<vmem>>, vector<1x128xf32>
    %122 = arith.addf %120, %121 : vector<1x128xf32>
    %123 = math.absf %0 : vector<128x128xf32>
    %cst_56 = arith.constant dense<0.000000e+00> : vector<128xf32>
    %124 = vector.multi_reduction <add>, %123, %cst_56 [0] : vector<128x128xf32> to vector<128xf32>
    %125 = vector.shape_cast %124 : vector<128xf32> to vector<1x128xf32>
    %cst_57 = arith.constant 0.000000e+00 : f32
    %126 = vector.broadcast %cst_57 : f32 to vector<1x128xf32>
    %127 = arith.cmpf oeq, %125, %126 : vector<1x128xf32>
    %c0_58 = arith.constant 0 : index
    %c0_59 = arith.constant 0 : index
    %128 = vector.load %arg16[%c0_58, %c0_59] : memref<1x128xf32, #tpu.memory_space<vmem>>, vector<1x128xf32>
    %129 = arith.select %127, %128, %122 : vector<1x128xi1>, vector<1x128xf32>
    %c0_60 = arith.constant 0 : index
    %c0_61 = arith.constant 0 : index
    %130 = vector.load %arg17[%c0_60, %c0_61] : memref<1x128xf32, #tpu.memory_space<vmem>>, vector<1x128xf32>
    tpu.vector_store %arg17[%c0_60, %c0_61], %129 {strides = array<i32>} : memref<1x128xf32, #tpu.memory_space<vmem>>, vector<1x128xf32>,
    return
  }
  func.func @transform_0(%arg0: i32) -> (i32, i32) {
    %c0_i32 = arith.constant 0 : i32
    %c0_i32_0 = arith.constant 0 : i32
    return %c0_i32, %arg0 : i32, i32
  }
  func.func @transform_1(%arg0: i32) -> (i32, i32) {
    %c0_i32 = arith.constant 0 : i32
    %c0_i32_0 = arith.constant 0 : i32
    %c0_i32_1 = arith.constant 0 : i32
    return %c0_i32, %c0_i32_0 : i32, i32
  }
  func.func @transform_2(%arg0: i32) -> (i32, i32) {
    %c0_i32 = arith.constant 0 : i32
    %c0_i32_0 = arith.constant 0 : i32
    %c0_i32_1 = arith.constant 0 : i32
    return %c0_i32, %c0_i32_0 : i32, i32
  }
  func.func @transform_3(%arg0: i32) -> (i32, i32) {
    %c0_i32 = arith.constant 0 : i32
    %c0_i32_0 = arith.constant 0 : i32
    %c0_i32_1 = arith.constant 0 : i32
    return %c0_i32, %c0_i32_0 : i32, i32
  }
  func.func @transform_4(%arg0: i32) -> (i32, i32) {
    %c0_i32 = arith.constant 0 : i32
    %c0_i32_0 = arith.constant 0 : i32
    %c0_i32_1 = arith.constant 0 : i32
    return %c0_i32, %c0_i32_0 : i32, i32
  }
  func.func @transform_5(%arg0: i32) -> (i32, i32) {
    %c0_i32 = arith.constant 0 : i32
    %c0_i32_0 = arith.constant 0 : i32
    %c0_i32_1 = arith.constant 0 : i32
    return %c0_i32, %c0_i32_0 : i32, i32
  }
  func.func @transform_6(%arg0: i32) -> (i32, i32) {
    %c0_i32 = arith.constant 0 : i32
    %c0_i32_0 = arith.constant 0 : i32
    %c0_i32_1 = arith.constant 0 : i32
    return %c0_i32, %c0_i32_0 : i32, i32
  }
  func.func @transform_7(%arg0: i32) -> (i32, i32) {
    %c0_i32 = arith.constant 0 : i32
    %c0_i32_0 = arith.constant 0 : i32
    %c0_i32_1 = arith.constant 0 : i32
    return %c0_i32, %c0_i32_0 : i32, i32
  }
  func.func @transform_8(%arg0: i32) -> (i32, i32) {
    %c0_i32 = arith.constant 0 : i32
    %c0_i32_0 = arith.constant 0 : i32
    %c0_i32_1 = arith.constant 0 : i32
    return %c0_i32, %c0_i32_0 : i32, i32
  }
  func.func @transform_9(%arg0: i32) -> (i32, i32) {
    %c0_i32 = arith.constant 0 : i32
    %c0_i32_0 = arith.constant 0 : i32
    %c0_i32_1 = arith.constant 0 : i32
    return %c0_i32, %c0_i32_0 : i32, i32
  }
  func.func @transform_10(%arg0: i32) -> (i32, i32) {
    %c0_i32 = arith.constant 0 : i32
    %c0_i32_0 = arith.constant 0 : i32
    %c0_i32_1 = arith.constant 0 : i32
    return %c0_i32, %c0_i32_0 : i32, i32
  }
  func.func @transform_11(%arg0: i32) -> (i32, i32) {
    %c0_i32 = arith.constant 0 : i32
    %c0_i32_0 = arith.constant 0 : i32
    %c0_i32_1 = arith.constant 0 : i32
    return %c0_i32, %c0_i32_0 : i32, i32
  }
  func.func @transform_12(%arg0: i32) -> (i32, i32) {
    %c0_i32 = arith.constant 0 : i32
    %c0_i32_0 = arith.constant 0 : i32
    %c0_i32_1 = arith.constant 0 : i32
    return %c0_i32, %c0_i32_0 : i32, i32
  }
  func.func @transform_13(%arg0: i32) -> (i32, i32) {
    %c0_i32 = arith.constant 0 : i32
    %c0_i32_0 = arith.constant 0 : i32
    return %c0_i32, %arg0 : i32, i32
  }
  func.func @transform_14(%arg0: i32) -> (i32, i32) {
    %c0_i32 = arith.constant 0 : i32
    %c0_i32_0 = arith.constant 0 : i32
    return %c0_i32, %arg0 : i32, i32
  }
  func.func @transform_15(%arg0: i32) -> (i32, i32) {
    %c0_i32 = arith.constant 0 : i32
    %c0_i32_0 = arith.constant 0 : i32
    return %c0_i32, %arg0 : i32, i32
  }
  func.func @transform_16(%arg0: i32) -> (i32, i32) {
    %c0_i32 = arith.constant 0 : i32
    %c0_i32_0 = arith.constant 0 : i32
    return %c0_i32, %arg0 : i32, i32
  }
}

</mosaic_0001>

<bundles_post_ra>
// kernel: qnet_forward.1
= control target key start
LH: loop header
LB: loop body
LE: loop exit
PB: predicated region body
PF: predicated region fallthrough
CT: control target
= control target key end

     0   :  { %v2257_v0 = vmov 0   ;;  %s4073_s2 = inlined_call_operand.vmem [shape: f32[128,1], index: 2, kind: input, shape index: {}]   ;;  %s4074_s0 = inlined_call_operand.vmem [shape: f32[128,128], index: 0, kind: input, shape index: {}]   ;;  %s4075_s1 = inlined_call_operand.vmem [shape: f32[128,128], index: 1, kind: input, shape index: {}]   ;;  %s4076_s3 = inlined_call_operand.vmem [shape: f32[128,1], index: 3, kind: input, shape index: {}]   ;;  %s4077_s4 = inlined_call_operand.vmem [shape: f32[128,1], index: 4, kind: input, shape index: {}]   ;;  %s4078_s6 = inlined_call_operand.vmem [shape: f32[128,1], index: 6, kind: input, shape index: {}]   ;;  %s4079_s7 = inlined_call_operand.vmem [shape: f32[128,1], index: 7, kind: input, shape index: {}]   ;;  %s4080_s8 = inlined_call_operand.vmem [shape: f32[128,1], index: 8, kind: input, shape index: {}]   ;;  %s4081_s10 = inlined_call_operand.vmem [shape: f32[128,1], index: 10, kind: input, shape index: {}]   ;;  %s4082_s11 = inlined_call_operand.vmem [shape: f32[128,1], index: 11, kind: input, shape index: {}]   ;;  %s4083_s12 = inlined_call_operand.vmem [shape: f32[128,1], index: 12, kind: input, shape index: {}]   ;;  %s4084_s5 = inlined_call_operand.vmem [shape: f32[128,128], index: 5, kind: input, shape index: {}]   ;;  %s4085_s9 = inlined_call_operand.vmem [shape: f32[128,128], index: 9, kind: input, shape index: {}]   ;;  %s4086_s13 = inlined_call_operand.vmem [shape: f32[128,128], index: 13, kind: input, shape index: {}]   ;;  %s4087_s14 = inlined_call_operand.vmem [shape: f32[1,128], index: 14, kind: input, shape index: {}]   ;;  %s4088_s15 = inlined_call_operand.vmem [shape: f32[1,128], index: 15, kind: input, shape index: {}]   ;;  %s4089_s16 = inlined_call_operand.vmem [shape: f32[1,128], index: 16, kind: output, shape index: {}]  }
   0x1   :  { %4106 = sst [smem:[#allocation17_spill]] %s4073_s2  ;;  %2154 = vset.pattern.permute.xlu2 %v2257_v0  ;;  %2153 = vset.pattern.permute.xlu1 %v2257_v0  ;;  %v2355_v4 = vld [vmem:[%s4074_s0 + $0x78] sm:$0xff]  ;;  %v2360_v5 = vld [vmem:[%s4074_s0 + $0x70] sm:$0xff]  ;;  %v2367_v6 = vld [vmem:[%s4074_s0 + $0x68] sm:$0xff] }
   0x2   :  { %s4107_s23 = sld [smem:[#allocation17_spill]]  ;;  %2152 = vset.pattern.permute.xlu0 %v2257_v0  ;;  %213 = vmatpush.msra.mxu0 %v2355_v4  ;;  %v2374_v7 = vld [vmem:[%s4074_s0 + $0x60] sm:$0xff]  ;;  %v2390_v11 = vld [vmem:[%s4074_s0 + $0x58] sm:$0xff]  ;;  %v2396_v12 = vld [vmem:[%s4074_s0 + $0x50] sm:$0xff]  ;;  %v2023_v56 = vand.u32 2147483647, %v2367_v6 }
   0x3   :  { %2103 = vmatpush.msra.mxu3 %v2355_v4  ;;  %v62_v13 = vld [vmem:[%s4074_s0 + $0x48] sm:$0xff]  ;;  %v2406_v14 = vld [vmem:[%s4074_s0 + $0x10] sm:$0xff]  ;;  %v2416_v16 = vld [vmem:[%s4074_s0] sm:$0xff]  ;;  %v2020_v46 = vand.u32 2147483647, %v2396_v12 }
   0x4   :  { %214 = vmatpush.msra.mxu0 %v2360_v5  ;;  %v2411_v15 = vld [vmem:[%s4074_s0 + $0x8] sm:$0xff]  ;;  %v2012_v17 = vand.u32 2147483647, %v2406_v14  ;;  %v2010_v19 = vand.u32 2147483647, %v2416_v16  ;;  %v2425_v20 = vld [vmem:[%s4074_s0 + $0x18] sm:$0xff] }
   0x5   :  { %2104 = vmatpush.msra.mxu3 %v2360_v5  ;;  %v2011_v18 = vand.u32 2147483647, %v2411_v15  ;;  %v61_v21 = vld [vmem:[%s4074_s0 + $0x40] sm:$0xff]  ;;  %v2013_v23 = vand.u32 2147483647, %v2425_v20  ;;  %v60_v28 = vld [vmem:[%s4074_s0 + $0x38] sm:$0xff] }
   0x6   :  { %215 = vmatpush.msra.mxu0 %v2367_v6  ;;  %v57_v27 = vld [vmem:[%s4074_s0 + $0x20] sm:$0xff]  ;;  %v58_v31 = vld [vmem:[%s4074_s0 + $0x28] sm:$0xff]  ;;  %v59_v32 = vld [vmem:[%s4074_s0 + $0x30] sm:$0xff]  ;;  %v2017_v37 = vand.u32 2147483647, %v60_v28 }
   0x7   :  { %2105 = vmatpush.msra.mxu3 %v2367_v6  ;;  %v2026_v24 = vadd.f32 %v2011_v18, %v2010_v19  ;;  %v2014_v29 = vand.u32 2147483647, %v57_v27  ;;  %v2015_v33 = vand.u32 2147483647, %v58_v31  ;;  %v2016_v35 = vand.u32 2147483647, %v59_v32 }
   0x8   :  { %v89_v1 = vld [vmem:[%s4107_s23 + $0x20] sm:$0xff]  ;;  %v87_v2 = vld [vmem:[%s4107_s23 + $0x10] sm:$0xff]  ;;  %v90_v8 = vld [vmem:[%s4107_s23 + $0x28] sm:$0xff]  ;;  %216 = vmatpush.msra.mxu0 %v2374_v7  ;;  %v2018_v42 = vand.u32 2147483647, %v61_v21 }
   0x9   :  { %v85_v3 = vld [vmem:[%s4107_s23] sm:$0xff]  ;;  %155 = vperm.xlu2 %2154, %v89_v1   ;;  %145 = vperm.xlu1 %2153, %v87_v2   ;;  %v88_v9 = vld [vmem:[%s4107_s23 + $0x18] sm:$0xff]  ;;  %v86_v10 = vld [vmem:[%s4107_s23 + $0x8] sm:$0xff]  ;;  %v2027_v30 = vadd.f32 %v2026_v24, %v2012_v17  ;;  %v2019_v44 = vand.u32 2147483647, %v62_v13 }
   0xa   :  { %135 = vperm.xlu0 %2152, %v85_v3   ;;  %217 = vmatpush.msra.mxu0 %v2390_v11  ;;  %v93_v22 = vld [vmem:[%s4107_s23 + $0x40] sm:$0xff]  ;;  %v92_v25 = vld [vmem:[%s4107_s23 + $0x38] sm:$0xff]  ;;  %v91_v26 = vld [vmem:[%s4107_s23 + $0x30] sm:$0xff]  ;;  %v2021_v48 = vand.u32 2147483647, %v2390_v11 }
   0xb   :  { %2106 = vmatpush.msra.mxu3 %v2374_v7  ;;  %v2028_v34 = vadd.f32 %v2027_v30, %v2013_v23  ;;  %v96_v38 = vld [vmem:[%s4107_s23 + $0x58] sm:$0xff]  ;;  %v95_v40 = vld [vmem:[%s4107_s23 + $0x50] sm:$0xff]  ;;  %v94_v41 = vld [vmem:[%s4107_s23 + $0x48] sm:$0xff]  ;;  %v2022_v53 = vand.u32 2147483647, %v2374_v7 }
   0xc   :  { %218 = vmatpush.msra.mxu0 %v2396_v12  ;;  %v99_v50 = vld [vmem:[%s4107_s23 + $0x70] sm:$0xff]  ;;  %v69_v51 = vld [vmem:[%s4075_s1] sm:$0xff]  ;;  %v98_v52 = vld [vmem:[%s4107_s23 + $0x68] sm:$0xff]  ;;  %v2024_v58 = vand.u32 2147483647, %v2360_v5 }
   0xd   :  { %2107 = vmatpush.msra.mxu3 %v2390_v11  ;;  %v2029_v36 = vadd.f32 %v2028_v34, %v2014_v29  ;;  %v97_v55 = vld [vmem:[%s4107_s23 + $0x60] sm:$0xff]  ;;  %v2025_v60 = vand.u32 2147483647, %v2355_v4  ;;  %v102_v62 = vld [vmem:[%s4076_s3 + $0x8] sm:$0xff]  ;;  %v100_v2 = vld [vmem:[%s4107_s23 + $0x78] sm:$0xff] }
   0xe   :  { %219 = vmatpush.msra.mxu0 %v62_v13  ;;  %v70_v63 = vld [vmem:[%s4075_s1 + $0x8] sm:$0xff]  ;;  %v101_v0 = vld [vmem:[%s4076_s3] sm:$0xff]  ;;  %v115_v5 = vld [vmem:[%s4076_s3 + $0x70] sm:$0xff] }
   0xf   :  { %2108 = vmatpush.msra.mxu3 %v2396_v12  ;;  %v2030_v39 = vadd.f32 %v2029_v36, %v2015_v33  ;;  %v81_v3 = vld [vmem:[%s4075_s1 + $0x60] sm:$0xff]  ;;  %v71_v6 = vld [vmem:[%s4075_s1 + $0x10] sm:$0xff]  ;;  %v116_v7 = vld [vmem:[%s4076_s3 + $0x78] sm:$0xff] }
  0x10   :  { %220 = vmatpush.msra.mxu0 %v61_v21  ;;  %v72_v11 = vld [vmem:[%s4075_s1 + $0x18] sm:$0xff]  ;;  %v131_v18 = vld [vmem:[%s4077_s4 + $0x70] sm:$0xff]  ;;  %v126_v30 = vld [vmem:[%s4077_s4 + $0x48] sm:$0xff] }
  0x11   :  { %160 = vperm.xlu2 %2154, %v90_v8   ;;  %150 = vperm.xlu1 %2153, %v88_v9   ;;  %v2031_v43 = vadd.f32 %v2030_v39, %v2016_v35  ;;  %v103_v8 = vld [vmem:[%s4076_s3 + $0x10] sm:$0xff]  ;;  %v82_v9 = vld [vmem:[%s4075_s1 + $0x68] sm:$0xff]  ;;  %v132_v12 = vld [vmem:[%s4077_s4 + $0x78] sm:$0xff] }
  0x12   :  { %140 = vperm.xlu0 %2152, %v86_v10   ;;  %221 = vmatpush.msra.mxu0 %v60_v28  ;;  %v113_v10 = vld [vmem:[%s4076_s3 + $0x60] sm:$0xff]  ;;  %v112_v17 = vld [vmem:[%s4076_s3 + $0x58] sm:$0xff]  ;;  %v111_v23 = vld [vmem:[%s4076_s3 + $0x50] sm:$0xff] }
  0x13   :  { %2109 = vmatpush.msra.mxu3 %v62_v13  ;;  %v2032_v45 = vadd.f32 %v2031_v43, %v2017_v37  ;;  %v114_v13 = vld [vmem:[%s4076_s3 + $0x68] sm:$0xff]  ;;  %v84_v19 = vld [vmem:[%s4075_s1 + $0x78] sm:$0xff]  ;;  %v127_v24 = vld [vmem:[%s4077_s4 + $0x50] sm:$0xff] }
  0x14   :  { %222 = vmatpush.msra.mxu0 %v59_v32  ;;  %v76_v29 = vld [vmem:[%s4075_s1 + $0x38] sm:$0xff]  ;;  %v77_v33 = vld [vmem:[%s4075_s1 + $0x40] sm:$0xff]  ;;  %v106_v34 = vld [vmem:[%s4076_s3 + $0x28] sm:$0xff] }
  0x15   :  { %2110 = vmatpush.msra.mxu3 %v61_v21  ;;  %v2033_v47 = vadd.f32 %v2032_v45, %v2018_v42  ;;  %v74_v21 = vld [vmem:[%s4075_s1 + $0x28] sm:$0xff]  ;;  %v125_v35 = vld [vmem:[%s4077_s4 + $0x40] sm:$0xff]  ;;  %v104_v36 = vld [vmem:[%s4076_s3 + $0x18] sm:$0xff] }
  0x16   :  { %223 = vmatpush.msra.mxu0 %v58_v31  ;;  %v78_v37 = vld [vmem:[%s4075_s1 + $0x48] sm:$0xff]  ;;  %v105_v39 = vld [vmem:[%s4076_s3 + $0x20] sm:$0xff]  ;;  %v80_v45 = vld [vmem:[%s4075_s1 + $0x58] sm:$0xff] }
  0x17   :  { %2111 = vmatpush.msra.mxu3 %v60_v28  ;;  %v2034_v49 = vadd.f32 %v2033_v47, %v2019_v44  ;;  %v107_v28 = vld [vmem:[%s4076_s3 + $0x30] sm:$0xff]  ;;  %v121_v42 = vld [vmem:[%s4077_s4 + $0x20] sm:$0xff]  ;;  %v122_v43 = vld [vmem:[%s4077_s4 + $0x28] sm:$0xff] }
  0x18   :  { %224 = vmatpush.msra.mxu0 %v57_v27  ;;  %v117_v44 = vld [vmem:[%s4077_s4] sm:$0xff]  ;;  %v119_v47 = vld [vmem:[%s4077_s4 + $0x10] sm:$0xff] }
  0x19   :  { %175 = vperm.xlu2 %2154, %v93_v22   ;;  %170 = vperm.xlu1 %2153, %v92_v25   ;;  %v2035_v54 = vadd.f32 %v2034_v49, %v2020_v46  ;;  %v129_v22 = vld [vmem:[%s4077_s4 + $0x60] sm:$0xff]  ;;  %v75_v25 = vld [vmem:[%s4075_s1 + $0x30] sm:$0xff]  ;;  %v118_v46 = vld [vmem:[%s4077_s4 + $0x8] sm:$0xff] }
  0x1a   :  { %165 = vperm.xlu0 %2152, %v91_v26   ;;  %225 = vmatpush.msra.mxu0 %v2425_v20  ;;  %v109_v26 = vld [vmem:[%s4076_s3 + $0x40] sm:$0xff]  ;;  %v704_v49 = vld [vmem:[%s4078_s6 + $0x8] sm:$0xff] }
  0x1b   :  { %2112 = vmatpush.msra.mxu3 %v59_v32  ;;  %v2036_v57 = vadd.f32 %v2035_v54, %v2021_v48  ;;  %v124_v32 = vld [vmem:[%s4077_s4 + $0x38] sm:$0xff]  ;;  %v705_v48 = vld [vmem:[%s4078_s6 + $0x10] sm:$0xff]  ;;  %v711_v54 = vld [vmem:[%s4078_s6 + $0x40] sm:$0xff] }
  0x1c   :  { %226 = vmatpush.msra.mxu0 %v2406_v14 }
  0x1d   :  { %2113 = vmatpush.msra.mxu3 %v58_v31  ;;  %v2037_v59 = vadd.f32 %v2036_v57, %v2022_v53  ;;  %v108_v31 = vld [vmem:[%s4076_s3 + $0x38] sm:$0xff] }
  0x1e   :  { %227 = vmatpush.msra.mxu0 %v2411_v15  ;;  %v706_v53 = vld [vmem:[%s4078_s6 + $0x18] sm:$0xff] }
  0x1f   :  { %2114 = vmatpush.msra.mxu3 %v57_v27  ;;  %v2038_v61 = vadd.f32 %v2037_v59, %v2023_v56  ;;  %v128_v27 = vld [vmem:[%s4077_s4 + $0x58] sm:$0xff]  ;;  %v709_v56 = vld [vmem:[%s4078_s6 + $0x30] sm:$0xff]  ;;  %v712_v59 = vld [vmem:[%s4078_s6 + $0x48] sm:$0xff] }
  0x20   :  { %228 = vmatpush.msra.mxu0 %v2416_v16  ;;  %v714_v57 = vld [vmem:[%s4078_s6 + $0x58] sm:$0xff] }
  0x21   :  { %190 = vperm.xlu2 %2154, %v96_v38   ;;  %185 = vperm.xlu1 %2153, %v95_v40   ;;  %v2039_v1 = vadd.f32 %v2038_v61, %v2024_v58  ;;  %v123_v38 = vld [vmem:[%s4077_s4 + $0x30] sm:$0xff]  ;;  %v120_v40 = vld [vmem:[%s4077_s4 + $0x18] sm:$0xff] }
  0x22   :  { %180 = vperm.xlu0 %2152, %v94_v41   ;;  %229 = vmatmul.f32.vlgmr.msra.gmra.mxu0 %v69_v51  ;;  %v79_v41 = vld [vmem:[%s4075_s1 + $0x50] sm:$0xff]  ;;  %v708_v51 = vld [vmem:[%s4078_s6 + $0x28] sm:$0xff] }
  0x23   :  { %2115 = vmatpush.msra.mxu3 %v2425_v20  ;;  %v2504_v4 = vadd.f32 %v2039_v1, %v2025_v60  ;;  %v110_v20 = vld [vmem:[%s4076_s3 + $0x48] sm:$0xff]  ;;  %v713_v58 = vld [vmem:[%s4078_s6 + $0x50] sm:$0xff] }
  0x24   :  { %v717_v60 = vld [vmem:[%s4078_s6 + $0x70] sm:$0xff] }
  0x25   :  { %2116 = vmatpush.msra.mxu3 %v2406_v14  ;;  %4108 = vst [vmem:[#allocation2_spill] sm:$0xff] %v2504_v4  ;;  %v83_v14 = vld [vmem:[%s4075_s1 + $0x70] sm:$0xff] }
  0x27   :  { %2117 = vmatpush.msra.mxu3 %v2411_v15  ;;  %v130_v15 = vld [vmem:[%s4077_s4 + $0x68] sm:$0xff] }
  0x29   :  { %205 = vperm.xlu2 %2154, %v99_v50   ;;  %200 = vperm.xlu1 %2153, %v98_v52   ;;  %v703_v50 = vld [vmem:[%s4078_s6] sm:$0xff] }
  0x2a   :  { %195 = vperm.xlu0 %2152, %v97_v55   ;;  %2118 = vmatpush.msra.mxu3 %v2416_v16  ;;  %v73_v16 = vld [vmem:[%s4075_s1 + $0x20] sm:$0xff]  ;;  %v710_v55 = vld [vmem:[%s4078_s6 + $0x38] sm:$0xff] }
  0x2b   :  { %232 = vmatmul.f32.gmra.mxu0 %v70_v63  ;;  %265 = vmatmul.f32.vlgmr.msra.gmra.mxu3 %v81_v3  ;;  %v707_v52 = vld [vmem:[%s4078_s6 + $0x20] sm:$0xff]  ;;  %v718_v3 = vld [vmem:[%s4078_s6 + $0x78] sm:$0xff] }
  0x2c   :  { %v715_v63 = vld [vmem:[%s4078_s6 + $0x60] sm:$0xff] }
  0x31   :  { %358 = vperm.xlu2 %2154, %v102_v62   ;;  %353 = vperm.xlu1 %2153, %v101_v0   ;;  %v716_v62 = vld [vmem:[%s4078_s6 + $0x68] sm:$0xff] }
  0x32   :  { %210 = vperm.xlu0 %2152, %v100_v2   ;;  %v720_v0 = vld [vmem:[%s4079_s7 + $0x8] sm:$0xff]  ;;  %v719_v2 = vld [vmem:[%s4079_s7] sm:$0xff] }
  0x33   :  { %235 = vmatmul.f32.gmra.mxu0 %v71_v6  ;;  %268 = vmatmul.f32.gmra.mxu3 %v82_v9 }
  0x39   :  { %423 = vperm.xlu2 %2154, %v115_v5   ;;  %428 = vperm.xlu1 %2153, %v116_v7   ;;  %v723_v5 = vld [vmem:[%s4079_s7 + $0x20] sm:$0xff]  ;;  %v722_v7 = vld [vmem:[%s4079_s7 + $0x18] sm:$0xff] }
  0x3a   :  { %363 = vperm.xlu0 %2152, %v103_v8   ;;  %v721_v8 = vld [vmem:[%s4079_s7 + $0x10] sm:$0xff] }
  0x3b   :  { %238 = vmatmul.f32.gmra.mxu0 %v72_v11  ;;  %271 = vmatmul.f32.gmra.mxu3 %v83_v14 }
  0x41   :  { %413 = vperm.xlu2 %2154, %v113_v10   ;;  %540 = vperm.xlu1 %2153, %v132_v12   ;;  %v726_v10 = vld [vmem:[%s4079_s7 + $0x38] sm:$0xff] }
  0x42   :  { %418 = vperm.xlu0 %2152, %v114_v13   ;;  %v725_v13 = vld [vmem:[%s4079_s7 + $0x30] sm:$0xff] }
  0x43   :  { %241 = vmatmul.f32.gmra.mxu0 %v73_v16  ;;  %274 = vmatmul.f32.gmra.mxu3 %v84_v19  ;;  %v733_v19 = vld [vmem:[%s4079_s7 + $0x70] sm:$0xff] }
  0x49   :  { %530 = vperm.xlu2 %2154, %v130_v15   ;;  %408 = vperm.xlu1 %2153, %v112_v17   ;;  %v724_v15 = vld [vmem:[%s4079_s7 + $0x28] sm:$0xff] }
  0x4a   :  { %535 = vperm.xlu0 %2152, %v131_v18   ;;  %v732_v17 = vld [vmem:[%s4079_s7 + $0x68] sm:$0xff] }
  0x4b   :  { %244 = vmatmul.f32.gmra.mxu0 %v74_v21 }
  0x51   :  { %398 = vperm.xlu2 %2154, %v110_v20   ;;  %525 = vperm.xlu1 %2153, %v129_v22   ;;  %v734_v20 = vld [vmem:[%s4079_s7 + $0x78] sm:$0xff] }
  0x52   :  { %403 = vperm.xlu0 %2152, %v111_v23   ;;  %v749_v23 = vld [vmem:[%s4080_s8 + $0x70] sm:$0xff] }
  0x53   :  { %247 = vmatmul.f32.gmra.mxu0 %v75_v25 }
  0x59   :  { %515 = vperm.xlu2 %2154, %v127_v24   ;;  %393 = vperm.xlu1 %2153, %v109_v26   ;;  %v731_v26 = vld [vmem:[%s4079_s7 + $0x60] sm:$0xff] }
  0x5a   :  { %520 = vperm.xlu0 %2152, %v128_v27   ;;  %v750_v27 = vld [vmem:[%s4080_s8 + $0x78] sm:$0xff] }
  0x5b   :  { %250 = vmatmul.f32.gmra.mxu0 %v76_v29 }
  0x61   :  { %383 = vperm.xlu2 %2154, %v107_v28   ;;  %510 = vperm.xlu1 %2153, %v126_v30   ;;  %v729_v30 = vld [vmem:[%s4079_s7 + $0x50] sm:$0xff] }
  0x62   :  { %388 = vperm.xlu0 %2152, %v108_v31  }
  0x63   :  { %253 = vmatmul.f32.gmra.mxu0 %v77_v33  ;;  %v2710_v14 = vpop.permute.xlu2 %155  ;;  %v730_v33 = vld [vmem:[%s4079_s7 + $0x58] sm:$0xff] }
  0x69   :  { %500 = vperm.xlu2 %2154, %v124_v32   ;;  %378 = vperm.xlu1 %2153, %v106_v34   ;;  %v748_v32 = vld [vmem:[%s4080_s8 + $0x68] sm:$0xff] }
  0x6a   :  { %505 = vperm.xlu0 %2152, %v125_v35  }
  0x6b   :  { %256 = vmatmul.f32.gmra.mxu0 %v78_v37  ;;  %v161_v22 = vpop.permute.xlu2 %160  ;;  %v746_v37 = vld [vmem:[%s4080_s8 + $0x58] sm:$0xff] }
  0x71   :  { %368 = vperm.xlu2 %2154, %v104_v36   ;;  %495 = vperm.xlu1 %2153, %v123_v38  }
  0x72   :  { %373 = vperm.xlu0 %2152, %v105_v39   ;;  %v728_v39 = vld [vmem:[%s4079_s7 + $0x48] sm:$0xff] }
  0x73   :  { %259 = vmatmul.f32.gmra.mxu0 %v79_v41  ;;  %v2733_v29 = vpop.permute.xlu2 %175 }
  0x79   :  { %480 = vperm.xlu2 %2154, %v120_v40   ;;  %485 = vperm.xlu1 %2153, %v121_v42   ;;  %v747_v40 = vld [vmem:[%s4080_s8 + $0x60] sm:$0xff] }
  0x7a   :  { %490 = vperm.xlu0 %2152, %v122_v43   ;;  %v744_v43 = vld [vmem:[%s4080_s8 + $0x48] sm:$0xff] }
  0x7b   :  { %262 = vmatmul.f32.gmra.mxu0 %v80_v45  ;;  %v146_v11 = vpop.permute.xlu1 %145  ;;  %v2748_v36 = vpop.permute.xlu2 %190 }
  0x7c   :  { %v136_v9 = vpop.permute.xlu0 %135 }
  0x81   :  { %465 = vperm.xlu2 %2154, %v117_v44   ;;  %470 = vperm.xlu1 %2153, %v118_v46   ;;  %v745_v46 = vld [vmem:[%s4080_s8 + $0x50] sm:$0xff] }
  0x82   :  { %475 = vperm.xlu0 %2152, %v119_v47  }
  0x83   :  { %v151_v21 = vpop.permute.xlu1 %150  ;;  %v2771_v47 = vpop.permute.xlu2 %205 }
  0x84   :  { %v141_v16 = vpop.permute.xlu0 %140 }
  0x89   :  { %763 = vperm.xlu2 %2154, %v705_v48   ;;  %758 = vperm.xlu1 %2153, %v704_v49   ;;  %v727_v49 = vld [vmem:[%s4079_s7 + $0x40] sm:$0xff] }
  0x8a   :  { %753 = vperm.xlu0 %2152, %v703_v50  }
  0x8b   :  { %v171_v28 = vpop.permute.xlu1 %170 }
  0x8c   :  { %v166_v24 = vpop.permute.xlu0 %165 }
  0x91   :  { %778 = vperm.xlu2 %2154, %v708_v51   ;;  %773 = vperm.xlu1 %2153, %v707_v52  }
  0x92   :  { %768 = vperm.xlu0 %2152, %v706_v53  }
  0x93   :  { %v2746_v35 = vpop.permute.xlu1 %185 }
  0x94   :  { %v2744_v34 = vpop.permute.xlu0 %180 }
  0x99   :  { %793 = vperm.xlu2 %2154, %v711_v54   ;;  %788 = vperm.xlu1 %2153, %v710_v55  }
  0x9a   :  { %783 = vperm.xlu0 %2152, %v709_v56  }
  0x9b   :  { %v2766_v44 = vpop.permute.xlu1 %200 }
  0x9c   :  { %v2759_v41 = vpop.permute.xlu0 %195 }
  0x9f   :  { %v2674_v61 = vpop.f32.mrf.mxu0 }
  0xa0   :  { %v2780_v50 = vadd.f32 %v2674_v61, %v136_v9 }
  0xa1   :  { %808 = vperm.xlu2 %2154, %v714_v57   ;;  %803 = vperm.xlu1 %2153, %v713_v58  }
  0xa2   :  { %798 = vperm.xlu0 %2152, %v712_v59   ;;  %v300_v55 = vmul.f32 %v2780_v50, %v2780_v50  ;;  %v741_v59 = vld [vmem:[%s4080_s8 + $0x30] sm:$0xff] }
  0xa4   :  { %v2789_v54 = vpop.permute.xlu0 %210 }
  0xa8   :  { %v2685_v1 = vpop.f32.mrf.mxu0 }
  0xa9   :  { %823 = vperm.xlu2 %2154, %v717_v60   ;;  %818 = vperm.xlu1 %2153, %v716_v62   ;;  %v2774_v48 = vadd.f32 %v2685_v1, %v141_v16  ;;  %v742_v62 = vld [vmem:[%s4080_s8 + $0x38] sm:$0xff] }
  0xaa   :  { %813 = vperm.xlu0 %2152, %v715_v63  }
  0xab   :  { %v301_v52 = vmul.f32 %v2774_v48, %v2774_v48  ;;  %v278_v56 = vadd.f32 %v2774_v48, %v2780_v50 }
  0xad   :  { %v316_v63 = vadd.f32 %v301_v52, %v300_v55 }
  0xae   :  { %v2761_v42 = vpop.f32.mrf.mxu3 }
  0xaf   :  { %v2875_v52 = vadd.f32 %v2761_v42, %v2759_v41 }
  0xb0   :  { %v2696_v6 = vpop.f32.mrf.mxu0 }
  0xb1   :  { %976 = vperm.xlu2 %2154, %v720_v0   ;;  %971 = vperm.xlu1 %2153, %v719_v2   ;;  %v2783_v51 = vadd.f32 %v2696_v6, %v146_v11  ;;  %v2816_v6 = vpop.permute.xlu2 %358 }
  0xb2   :  { %828 = vperm.xlu0 %2152, %v718_v3   ;;  %v743_v3 = vld [vmem:[%s4080_s8 + $0x40] sm:$0xff] }
  0xb3   :  { %v302_v57 = vmul.f32 %v2783_v51, %v2783_v51  ;;  %v279_v0 = vadd.f32 %v278_v56, %v2783_v51 }
  0xb6   :  { %v269_v60 = vpop.f32.mrf.mxu3 }
  0xb8   :  { %v239_v12 = vpop.f32.mrf.mxu0 }
  0xb9   :  { %991 = vperm.xlu2 %2154, %v723_v5   ;;  %986 = vperm.xlu1 %2153, %v722_v7   ;;  %v2787_v53 = vadd.f32 %v239_v12, %v151_v21  ;;  %v2814_v5 = vpop.permute.xlu1 %353  ;;  %v317_v7 = vadd.f32 %v316_v63, %v302_v57 }
  0xba   :  { %981 = vperm.xlu0 %2152, %v721_v8  }
  0xbb   :  { %v303_v1 = vmul.f32 %v2787_v53, %v2787_v53  ;;  %v280_v8 = vadd.f32 %v279_v0, %v2787_v53 }
  0xbd   :  { %v318_v11 = vadd.f32 %v317_v7, %v303_v1 }
  0xc0   :  { %v242_v18 = vpop.f32.mrf.mxu0 }
  0xc1   :  { %1006 = vperm.xlu2 %2154, %v726_v10   ;;  %1001 = vperm.xlu1 %2153, %v725_v13   ;;  %v2798_v58 = vadd.f32 %v242_v18, %v2710_v14 }
  0xc2   :  { %996 = vperm.xlu0 %2152, %v724_v15  }
  0xc3   :  { %v304_v9 = vmul.f32 %v2798_v58, %v2798_v58  ;;  %v281_v12 = vadd.f32 %v280_v8, %v2798_v58 }
  0xc5   :  { %v319_v15 = vadd.f32 %v318_v11, %v304_v9 }
  0xc8   :  { %v245_v25 = vpop.f32.mrf.mxu0 }
  0xc9   :  { %1036 = vperm.xlu2 %2154, %v732_v17   ;;  %1041 = vperm.xlu1 %2153, %v733_v19   ;;  %v2809_v2 = vadd.f32 %v245_v25, %v161_v22  ;;  %v738_v19 = vld [vmem:[%s4080_s8 + $0x18] sm:$0xff]  ;;  %v739_v22 = vld [vmem:[%s4080_s8 + $0x20] sm:$0xff] }
  0xca   :  { %1046 = vperm.xlu0 %2152, %v734_v20   ;;  %v2837_v20 = vpop.permute.xlu0 %363 }
  0xcb   :  { %v305_v13 = vmul.f32 %v2809_v2, %v2809_v2  ;;  %v282_v16 = vadd.f32 %v281_v12, %v2809_v2 }
  0xd0   :  { %v248_v31 = vpop.f32.mrf.mxu0 }
  0xd1   :  { %1153 = vperm.xlu2 %2154, %v749_v23   ;;  %1031 = vperm.xlu1 %2153, %v731_v26   ;;  %v2821_v10 = vadd.f32 %v248_v31, %v166_v24  ;;  %v320_v23 = vadd.f32 %v319_v15, %v305_v13  ;;  %v1338_v13 = vld [vmem:[%s4081_s10 + $0x8] sm:$0xff] }
  0xd2   :  { %1158 = vperm.xlu0 %2152, %v750_v27   ;;  %v740_v27 = vld [vmem:[%s4080_s8 + $0x28] sm:$0xff] }
  0xd3   :  { %v306_v17 = vmul.f32 %v2821_v10, %v2821_v10  ;;  %v283_v24 = vadd.f32 %v282_v16, %v2821_v10 }
  0xd8   :  { %v251_v38 = vpop.f32.mrf.mxu0 }
  0xd9   :  { %1021 = vperm.xlu2 %2154, %v729_v30   ;;  %1148 = vperm.xlu1 %2153, %v748_v32   ;;  %v2826_v14 = vadd.f32 %v251_v38, %v171_v28  ;;  %v272_v28 = vpop.f32.mrf.mxu3 }
  0xda   :  { %1026 = vperm.xlu0 %2152, %v730_v33   ;;  %v2857_v33 = vpop.permute.xlu1 %428  ;;  %v2895_v1 = vadd.f32 %v272_v28, %v2771_v47  ;;  %v1339_v47 = vld [vmem:[%s4081_s10 + $0x10] sm:$0xff] }
  0xdb   :  { %v307_v25 = vmul.f32 %v2826_v14, %v2826_v14  ;;  %v284_v30 = vadd.f32 %v283_v24, %v2826_v14 }
  0xdc   :  { %v314_v15 = vmul.f32 %v2895_v1, %v2895_v1 }
  0xe0   :  { %v254_v45 = vpop.f32.mrf.mxu0 }
  0xe1   :  { %1138 = vperm.xlu2 %2154, %v746_v37   ;;  %1016 = vperm.xlu1 %2153, %v728_v39   ;;  %v2832_v18 = vadd.f32 %v254_v45, %v2733_v29  ;;  %v321_v29 = vadd.f32 %v320_v23, %v306_v17  ;;  %v275_v0 = vpop.f32.mrf.mxu3 }
  0xe2   :  { %1143 = vperm.xlu0 %2152, %v747_v40   ;;  %v2905_v9 = vadd.f32 %v275_v0, %v2789_v54  ;;  %v1337_v54 = vld [vmem:[%s4081_s10] sm:$0xff]  ;;  %v1343_v0 = vld [vmem:[%s4081_s10 + $0x30] sm:$0xff] }
  0xe3   :  { %v308_v31 = vmul.f32 %v2832_v18, %v2832_v18  ;;  %v322_v37 = vadd.f32 %v321_v29, %v307_v25  ;;  %v285_v38 = vadd.f32 %v284_v30, %v2832_v18  ;;  %v1342_v29 = vld [vmem:[%s4081_s10 + $0x28] sm:$0xff] }
  0xe5   :  { %v323_v40 = vadd.f32 %v322_v37, %v308_v31  ;;  %v1341_v31 = vld [vmem:[%s4081_s10 + $0x20] sm:$0xff] }
  0xe8   :  { %v257_v61 = vpop.f32.mrf.mxu0 }
  0xe9   :  { %1128 = vperm.xlu2 %2154, %v744_v43   ;;  %1133 = vperm.xlu1 %2153, %v745_v46   ;;  %v2846_v26 = vadd.f32 %v257_v61, %v2744_v34  ;;  %v2859_v34 = vpop.permute.xlu2 %423  ;;  %v2884_v61 = vpop.permute.xlu0 %418 }
  0xea   :  { %1011 = vperm.xlu0 %2152, %v727_v49   ;;  %v736_v49 = vld [vmem:[%s4080_s8 + $0x8] sm:$0xff] }
  0xeb   :  { %v309_v39 = vmul.f32 %v2846_v26, %v2846_v26  ;;  %v286_v43 = vadd.f32 %v285_v38, %v2846_v26 }
  0xed   :  { %v324_v55 = vadd.f32 %v323_v40, %v309_v39  ;;  %v1340_v40 = vld [vmem:[%s4081_s10 + $0x18] sm:$0xff] }
  0xf0   :  { %v260_v21 = vpop.f32.mrf.mxu0 }
  0xf1   :  { %1113 = vperm.xlu2 %2154, %v741_v59   ;;  %1118 = vperm.xlu1 %2153, %v742_v62   ;;  %v2855_v32 = vadd.f32 %v260_v21, %v2746_v35  ;;  %v735_v35 = vld [vmem:[%s4080_s8] sm:$0xff]  ;;  %v737_v59 = vld [vmem:[%s4080_s8 + $0x10] sm:$0xff]  ;;  %v2887_v62 = vadd.f32 %v269_v60, %v2766_v44  ;;  %v2898_v44 = vpop.permute.xlu1 %540  ;;  %v2900_v60 = vpop.permute.xlu2 %413 }
  0xf2   :  { %1123 = vperm.xlu0 %2152, %v743_v3   ;;  %v2923_v23 = vpop.permute.xlu0 %535 }
  0xf3   :  { %v310_v45 = vmul.f32 %v2855_v32, %v2855_v32  ;;  %v287_v56 = vadd.f32 %v286_v43, %v2855_v32  ;;  %v313_v8 = vmul.f32 %v2887_v62, %v2887_v62 }
  0xf5   :  { %v325_v63 = vadd.f32 %v324_v55, %v310_v45 }
  0xf8   :  { %v263_v46 = vpop.f32.mrf.mxu0 }
  0xf9   :  { %1098 = vperm.xlu2 %2154, %v738_v19   ;;  %1103 = vperm.xlu1 %2153, %v739_v22   ;;  %v2879_v57 = vadd.f32 %v263_v46, %v2748_v36  ;;  %v312_v36 = vmul.f32 %v2875_v52, %v2875_v52  ;;  %v315_v19 = vmul.f32 %v2905_v9, %v2905_v9  ;;  %v2928_v30 = vpop.permute.xlu1 %408  ;;  %v2933_v37 = vpop.permute.xlu2 %530 }
  0xfa   :  { %1108 = vperm.xlu0 %2152, %v740_v27  }
  0xfb   :  { %v288_v41 = vadd.f32 %v287_v56, %v2879_v57  ;;  %v311_v42 = vmul.f32 %v2879_v57, %v2879_v57 }
  0xfd   :  { %v289_v3 = vadd.f32 %v288_v41, %v2875_v52  ;;  %v326_v7 = vadd.f32 %v325_v63, %v311_v42  ;;  %v1344_v63 = vld [vmem:[%s4081_s10 + $0x38] sm:$0xff] }
  0xff   :  { %v290_v11 = vadd.f32 %v289_v3, %v2887_v62  ;;  %v327_v12 = vadd.f32 %v326_v7, %v312_v36 }
 0x101   :  { %1083 = vperm.xlu2 %2154, %v735_v35   ;;  %1088 = vperm.xlu1 %2153, %v736_v49   ;;  %v291_v16 = vadd.f32 %v290_v11, %v2895_v1  ;;  %v328_v17 = vadd.f32 %v327_v12, %v313_v8  ;;  %v404_v49 = vpop.permute.xlu0 %403  ;;  %v2949_v36 = vpop.permute.xlu1 %525 }
 0x102   :  { %1093 = vperm.xlu0 %2152, %v737_v59   ;;  %v1345_v59 = vld [vmem:[%s4081_s10 + $0x40] sm:$0xff]  ;;  %v399_v3 = vpop.permute.xlu2 %398 }
 0x103   :  { %v292_v21 = vadd.f32 %v291_v16, %v2905_v9  ;;  %v329_v22 = vadd.f32 %v328_v17, %v314_v15  ;;  %v1347_v15 = vld [vmem:[%s4081_s10 + $0x50] sm:$0xff]  ;;  %v1346_v16 = vld [vmem:[%s4081_s10 + $0x48] sm:$0xff] }
 0x105   :  { %v293_v24 = vrot.slane %v292_v21, 4  ;;  %v330_v25 = vadd.f32 %v329_v22, %v315_v19 }
 0x107   :  { %v294_v27 = vadd.f32 %v293_v24, %v292_v21  ;;  %v331_v28 = vrot.slane %v330_v25, 4  ;;  %v1351_v21 = vld [vmem:[%s4081_s10 + $0x70] sm:$0xff]  ;;  %v1350_v24 = vld [vmem:[%s4081_s10 + $0x68] sm:$0xff] }
 0x109   :  { %1397 = vperm.xlu2 %2154, %v1339_v47   ;;  %1392 = vperm.xlu1 %2153, %v1338_v13   ;;  %v295_v38 = vrot.slane %v294_v27, 2  ;;  %v332_v39 = vadd.f32 %v331_v28, %v330_v25  ;;  %v1348_v47 = vld [vmem:[%s4081_s10 + $0x58] sm:$0xff]  ;;  %v2956_v13 = vpop.permute.xlu0 %520  ;;  %v2964_v17 = vpop.permute.xlu1 %393  ;;  %v1349_v25 = vld [vmem:[%s4081_s10 + $0x60] sm:$0xff] }
 0x10a   :  { %1387 = vperm.xlu0 %2152, %v1337_v54   ;;  %v2966_v54 = vpop.permute.xlu2 %515 }
 0x10b   :  { %v296_v43 = vadd.f32 %v295_v38, %v294_v27  ;;  %v333_v45 = vrot.slane %v332_v39, 2 }
 0x10d   :  { %v297_v35 = vrot.slane %v296_v43, 1  ;;  %v334_v46 = vadd.f32 %v333_v45, %v332_v39  ;;  %v1353_v45 = vld [vmem:[%s4082_s11] sm:$0xff] }
 0x10f   :  { %v298_v55 = vadd.f32 %v297_v35, %v296_v43  ;;  %v335_v56 = vrot.slane %v334_v46, 1  ;;  %v1352_v35 = vld [vmem:[%s4081_s10 + $0x78] sm:$0xff] }
 0x111   :  { %1412 = vperm.xlu2 %2154, %v1342_v29   ;;  %1407 = vperm.xlu1 %2153, %v1341_v31   ;;  %v2944_v41 = vmul.f32 0.03125, %v298_v55  ;;  %v336_v42 = vadd.f32 %v335_v56, %v334_v46  ;;  %v2977_v27 = vpop.permute.xlu0 %388  ;;  %v2979_v31 = vpop.permute.xlu1 %510 }
 0x112   :  { %1402 = vperm.xlu0 %2152, %v1340_v40   ;;  %v2981_v39 = vpop.permute.xlu2 %383  ;;  %v1354_v40 = vld [vmem:[%s4082_s11 + $0x8] sm:$0xff] }
 0x113   :  { %v337_v7 = vmul.f32 0.03125, %v336_v42  ;;  %v338_v8 = vmul.f32 %v2944_v41, %v2944_v41 }
 0x115   :  { %v339_v11 = vsub.f32 %v337_v7, %v338_v8 }
 0x117   :  { %v340_v12 = vadd.f32 1e-05, %v339_v11 }
 0x119   :  { %1427 = vperm.xlu2 %2154, %v1345_v59   ;;  %1422 = vperm.xlu1 %2153, %v1344_v63   ;;  %2155 = vrsqrt.f32 %v340_v12  ;;  %vm347_vm1 = vweird.f32 %v340_v12  ;;  %v3002_v42 = vpop.permute.xlu0 %505 }
 0x11a   :  { %1417 = vperm.xlu0 %2152, %v1343_v0  }
 0x11f   :  { %v2156_v19 = vpop.eup %2155 }
 0x120   :  { %v342_v22 = vmul.f32 %v2156_v19, %v340_v12  ;;  %vm348_vm0 = vweird.f32 %v2156_v19 }
 0x121   :  { %1442 = vperm.xlu2 %2154, %v1348_v47   ;;  %1437 = vperm.xlu1 %2153, %v1347_v15   ;;  %vm349_vm2 = vmor %vm347_vm1, %vm348_vm0 }
 0x122   :  { %1432 = vperm.xlu0 %2152, %v1346_v16   ;;  %v343_v28 = vmul.f32 %v2156_v19, %v342_v22  ;;  %v3021_v16 = vpop.permute.xlu1 %378  ;;  %v3030_v22 = vpop.permute.xlu2 %500 }
 0x124   :  { %v344_v29 = vmul.f32 0.5, %v343_v28 }
 0x126   :  { %v345_v38 = vsub.f32 1.5, %v344_v29 }
 0x128   :  { %v346_v43 = vmul.f32 %v2156_v19, %v345_v38 }
 0x129   :  { %1457 = vperm.xlu2 %2154, %v1351_v21   ;;  %1452 = vperm.xlu1 %2153, %v1350_v24  }
 0x12a   :  { %1447 = vperm.xlu0 %2152, %v1349_v25   ;;  %v2992_v46 = vsel %vm349_vm2, %v2156_v19, %v346_v43 }
 0x12b   :  { %v442_v55 = vmul.f32 %v2928_v30, %v2992_v46  ;;  %v446_v56 = vmul.f32 %v2857_v33, %v2992_v46  ;;  %v445_v59 = vmul.f32 %v2859_v34, %v2992_v46  ;;  %v444_v63 = vmul.f32 %v2884_v61, %v2992_v46 }
 0x12c   :  { %v443_v0 = vmul.f32 %v2900_v60, %v2992_v46  ;;  %v441_v7 = vmul.f32 %v404_v49, %v2992_v46  ;;  %v440_v33 = vmul.f32 %v399_v3, %v2992_v46  ;;  %v1357_v60 = vld [vmem:[%s4082_s11 + $0x20] sm:$0xff] }
 0x12d   :  { %v458_v30 = vmul.f32 %v442_v55, %v2944_v41  ;;  %v462_v8 = vmul.f32 %v446_v56, %v2944_v41  ;;  %v570_v11 = vmul.f32 %v442_v55, %v2879_v57  ;;  %v574_v34 = vmul.f32 %v446_v56, %v2905_v9  ;;  %v1356_v57 = vld [vmem:[%s4082_s11 + $0x18] sm:$0xff] }
 0x12e   :  { %v461_v61 = vmul.f32 %v445_v59, %v2944_v41  ;;  %v460_v12 = vmul.f32 %v444_v63, %v2944_v41  ;;  %v573_v47 = vmul.f32 %v445_v59, %v2895_v1  ;;  %v459_v15 = vmul.f32 %v443_v0, %v2944_v41  ;;  %v1355_v1 = vld [vmem:[%s4082_s11 + $0x10] sm:$0xff]  ;;  %v374_v59 = vpop.permute.xlu0 %373 }
 0x12f   :  { %v558_v49 = vsub.f32 %v2898_v44, %v462_v8  ;;  %v554_v3 = vsub.f32 %v2956_v13, %v458_v30  ;;  %v572_v21 = vmul.f32 %v444_v63, %v2887_v62  ;;  %v457_v44 = vmul.f32 %v441_v7, %v2944_v41  ;;  %v1360_v8 = vld [vmem:[%s4082_s11 + $0x38] sm:$0xff] }
 0x130   :  { %v557_v9 = vsub.f32 %v2923_v23, %v461_v61  ;;  %v556_v19 = vsub.f32 %v2933_v37, %v460_v12  ;;  %v555_v24 = vsub.f32 %v2949_v36, %v459_v15  ;;  %v571_v25 = vmul.f32 %v443_v0, %v2875_v52 }
 0x131   :  { %1610 = vperm.xlu2 %2154, %v1354_v40   ;;  %1605 = vperm.xlu1 %2153, %v1353_v45   ;;  %v3035_v13 = vadd.f32 %v574_v34, %v558_v49  ;;  %v3039_v28 = vadd.f32 %v570_v11, %v554_v3  ;;  %v553_v37 = vsub.f32 %v2966_v54, %v457_v44  ;;  %v496_v49 = vpop.permute.xlu1 %495  ;;  %v3079_v3 = vpop.permute.xlu2 %368 }
 0x132   :  { %1462 = vperm.xlu0 %2152, %v1352_v35   ;;  %v3041_v23 = vadd.f32 %v573_v47, %v557_v9  ;;  %v3043_v62 = vadd.f32 %v572_v21, %v556_v19  ;;  %v456_v29 = vmul.f32 %v440_v33, %v2944_v41  ;;  %v3048_v40 = vadd.f32 %v571_v25, %v555_v24 }
 0x133   :  { %v622_v38 = vmin.f32 %v3035_v13, 0.0  ;;  %v439_v36 = vmul.f32 %v2964_v17, %v2992_v46  ;;  %v569_v45 = vmul.f32 %v441_v7, %v2855_v32  ;;  %v618_v55 = vmin.f32 %v3039_v28, 0.0 }
 0x134   :  { %v621_v52 = vmin.f32 %v3041_v23, 0.0  ;;  %v620_v43 = vmin.f32 %v3043_v62, 0.0  ;;  %v619_v54 = vmin.f32 %v3048_v40, 0.0  ;;  %v568_v56 = vmul.f32 %v440_v33, %v2846_v26  ;;  %v1359_v26 = vld [vmem:[%s4082_s11 + $0x30] sm:$0xff] }
 0x135   :  { %v653_v35 = vmul.f32 1.442695, %v622_v38  ;;  %v3058_v30 = vadd.f32 %v569_v45, %v553_v37  ;;  %v552_v17 = vsub.f32 %v2979_v31, %v456_v29  ;;  %v645_v7 = vmul.f32 1.442695, %v618_v55  ;;  %v1358_v31 = vld [vmem:[%s4082_s11 + $0x28] sm:$0xff]  ;;  %v1363_v38 = vld [vmem:[%s4082_s11 + $0x50] sm:$0xff] }
 0x136   :  { %v651_v63 = vmul.f32 1.442695, %v621_v52  ;;  %v649_v0 = vmul.f32 1.442695, %v620_v43  ;;  %v647_v32 = vmul.f32 1.442695, %v619_v54  ;;  %v455_v11 = vmul.f32 %v439_v36, %v2944_v41  ;;  %v491_v43 = vpop.permute.xlu0 %490 }
 0x137   :  { %2157 = vpow2.f32 %v653_v35  ;;  %v617_v33 = vmin.f32 %v3058_v30, 0.0  ;;  %v3069_v34 = vadd.f32 %v568_v56, %v552_v17  ;;  %v567_v12 = vmul.f32 %v439_v36, %v2832_v18 }
 0x138   :  { %2159 = vpow2.f32 %v651_v63  ;;  %v551_v61 = vsub.f32 %v3002_v42, %v455_v11  ;;  %vm606_vm3 = vcmp.gt.f32.partialorder %v3035_v13, 0.0  ;;  %v436_v9 = vmul.f32 %v3021_v16, %v2992_v46  ;;  %v1361_v63 = vld [vmem:[%s4082_s11 + $0x40] sm:$0xff] }
 0x139   :  { %1625 = vperm.xlu2 %2154, %v1357_v60   ;;  %1620 = vperm.xlu1 %2153, %v1356_v57   ;;  %2161 = vpow2.f32 %v649_v0  ;;  %v438_v60 = vmul.f32 %v2977_v27, %v2992_v46  ;;  %v643_v47 = vmul.f32 1.442695, %v617_v33  ;;  %v616_v15 = vmin.f32 %v3069_v34, 0.0 }
 0x13a   :  { %1615 = vperm.xlu0 %2152, %v1355_v1   ;;  %2163 = vpow2.f32 %v647_v32  ;;  %v3082_v57 = vadd.f32 %v567_v12, %v551_v61  ;;  %v437_v27 = vmul.f32 %v2981_v39, %v2992_v46  ;;  %vm605_vm4 = vcmp.gt.f32.partialorder %v3041_v23, 0.0 }
 0x13b   :  { %2165 = vpow2.f32 %v645_v7  ;;  %v454_v42 = vmul.f32 %v438_v60, %v2944_v41  ;;  %v641_v18 = vmul.f32 1.442695, %v616_v15  ;;  %v566_v1 = vmul.f32 %v438_v60, %v2826_v14  ;;  %v481_v60 = vpop.permute.xlu2 %480 }
 0x13c   :  { %2167 = vpow2.f32 %v643_v47  ;;  %v615_v21 = vmin.f32 %v3082_v57, 0.0  ;;  %vm602_vm5 = vcmp.gt.f32.partialorder %v3039_v28, 0.0  ;;  %v453_v37 = vmul.f32 %v437_v27, %v2944_v41 }
 0x13d   :  { %v2158_v19 = vpop.eup %2157  ;;  %v550_v44 = vsub.f32 %v3030_v22, %v454_v42  ;;  %2169 = vpow2.f32 %v641_v18  ;;  %v435_v39 = vmul.f32 %v374_v59, %v2992_v46  ;;  %v452_v14 = vmul.f32 %v436_v9, %v2944_v41  ;;  %v1362_v59 = vld [vmem:[%s4082_s11 + $0x48] sm:$0xff] }
 0x13e   :  { %v2160_v24 = vpop.eup %2159  ;;  %v2070_v25 = vadd.f32 -1.0, %v2158_v19  ;;  %v639_v36 = vmul.f32 1.442695, %v615_v21  ;;  %v549_v54 = vsub.f32 %v496_v49, %v453_v37  ;;  %v565_v55 = vmul.f32 %v437_v27, %v2821_v10 }
 0x13f   :  { %v2162_v29 = vpop.eup %2161  ;;  %v2069_v16 = vadd.f32 -1.0, %v2160_v24  ;;  %v3099_v52 = vadd.f32 %v566_v1, %v550_v44  ;;  %vm604_vm6 = vcmp.gt.f32.partialorder %v3043_v62, 0.0  ;;  %vm603_vm7 = vcmp.gt.f32.partialorder %v3048_v40, 0.0  ;;  %v1365_v1 = vld [vmem:[%s4082_s11 + $0x60] sm:$0xff] }
 0x140   :  { %v2164_v22 = vpop.eup %2163  ;;  %v3105_v45 = vsel %vm606_vm3, %v3035_v13, %v2070_v25  ;;  %v2068_v35 = vadd.f32 -1.0, %v2162_v29  ;;  %2171 = vpow2.f32 %v639_v36  ;;  %vm601_vm8 = vcmp.gt.f32.partialorder %v3058_v30, 0.0 }
 0x141   :  { %1640 = vperm.xlu2 %2154, %v1360_v8   ;;  %1635 = vperm.xlu1 %2153, %v1359_v26   ;;  %v2166_v56 = vpop.eup %2165  ;;  %v2067_v13 = vadd.f32 -1.0, %v2164_v22  ;;  %v3121_v0 = vsel %vm605_vm4, %v3041_v23, %v2069_v16  ;;  %v614_v17 = vmin.f32 %v3099_v52, 0.0  ;;  %v3125_v8 = vadd.f32 %v565_v55, %v549_v54  ;;  %v486_v23 = vpop.permute.xlu1 %485 }
 0x142   :  { %1630 = vperm.xlu0 %2152, %v1358_v31   ;;  %831 = vmatpush.msra.mxu1 %v3105_v45  ;;  %v2168_v10 = vpop.eup %2167  ;;  %v2066_v32 = vadd.f32 -1.0, %v2166_v56  ;;  %v548_v7 = vsub.f32 %v491_v43, %v452_v14  ;;  %v564_v11 = vmul.f32 %v436_v9, %v2809_v2  ;;  %v451_v26 = vmul.f32 %v435_v39, %v2944_v41  ;;  %v1366_v9 = vld [vmem:[%s4082_s11 + $0x68] sm:$0xff] }
 0x143   :  { %2119 = vmatpush.msrb.mxu3 %v3105_v45  ;;  %v2170_v33 = vpop.eup %2169  ;;  %v3134_v31 = vsel %vm604_vm6, %v3043_v62, %v2068_v35  ;;  %vm600_vm9 = vcmp.gt.f32.partialorder %v3069_v34, 0.0  ;;  %v637_v61 = vmul.f32 1.442695, %v614_v17  ;;  %v613_v12 = vmin.f32 %v3125_v8, 0.0 }
 0x144   :  { %832 = vmatpush.msra.mxu1 %v3121_v0  ;;  %v3143_v2 = vsel %vm603_vm7, %v3048_v40, %v2067_v13  ;;  %v2065_v49 = vadd.f32 -1.0, %v2168_v10  ;;  %v3145_v47 = vadd.f32 %v564_v11, %v548_v7  ;;  %v547_v62 = vsub.f32 %v486_v23, %v451_v26  ;;  %v1369_v23 = vld [vmem:[%s4083_s12] sm:$0xff] }
 0x145   :  { %2120 = vmatpush.msrb.mxu3 %v3121_v0  ;;  %2173 = vpow2.f32 %v637_v61  ;;  %v635_v15 = vmul.f32 1.442695, %v613_v12  ;;  %v563_v42 = vmul.f32 %v435_v39, %v2798_v58  ;;  %v434_v18 = vmul.f32 %v3079_v3, %v2992_v46  ;;  %v476_v39 = vpop.permute.xlu0 %475 }
 0x146   :  { %833 = vmatpush.msra.mxu1 %v3134_v31  ;;  %v2172_v27 = vpop.eup %2171  ;;  %v3155_v40 = vsel %vm602_vm5, %v3039_v28, %v2066_v32  ;;  %vm599_vm10 = vcmp.gt.f32.partialorder %v3082_v57, 0.0  ;;  %v612_v58 = vmin.f32 %v3145_v47, 0.0  ;;  %v433_v3 = vmul.f32 %v2837_v20, %v2992_v46  ;;  %v1364_v20 = vld [vmem:[%s4082_s11 + $0x58] sm:$0xff] }
 0x147   :  { %2121 = vmatpush.msrb.mxu3 %v3134_v31  ;;  %v2064_v19 = vadd.f32 -1.0, %v2170_v33  ;;  %2175 = vpow2.f32 %v635_v15  ;;  %v3164_v21 = vadd.f32 %v563_v42, %v547_v62  ;;  %v450_v44 = vmul.f32 %v434_v18, %v2944_v41 }
 0x148   :  { %834 = vmatpush.msra.mxu1 %v3143_v2  ;;  %v3172_v28 = vsel %vm601_vm8, %v3058_v30, %v2065_v49  ;;  %v2063_v24 = vadd.f32 -1.0, %v2172_v27  ;;  %v633_v25 = vmul.f32 1.442695, %v612_v58  ;;  %v449_v37 = vmul.f32 %v433_v3, %v2944_v41 }
 0x149   :  { %1655 = vperm.xlu2 %2154, %v1363_v38   ;;  %1650 = vperm.xlu1 %2153, %v1362_v59   ;;  %v611_v29 = vmin.f32 %v3164_v21, 0.0  ;;  %v546_v16 = vsub.f32 %v481_v60, %v450_v44  ;;  %v562_v30 = vmul.f32 %v434_v18, %v2787_v53  ;;  %v561_v38 = vmul.f32 %v433_v3, %v2783_v51  ;;  %v466_v59 = vpop.permute.xlu2 %465 }
 0x14a   :  { %1645 = vperm.xlu0 %2152, %v1361_v63   ;;  %2122 = vmatpush.msrb.mxu3 %v3143_v2  ;;  %2177 = vpow2.f32 %v633_v25  ;;  %v545_v36 = vsub.f32 %v476_v39, %v449_v37  ;;  %v432_v14 = vmul.f32 %v2816_v6, %v2992_v46  ;;  %v431_v22 = vmul.f32 %v2814_v5, %v2992_v46  ;;  %v471_v63 = vpop.permute.xlu1 %470 }
 0x14b   :  { %835 = vmatpush.msra.mxu1 %v3155_v40  ;;  %v2174_v43 = vpop.eup %2173  ;;  %v3193_v53 = vsel %vm600_vm9, %v3069_v34, %v2064_v19  ;;  %vm598_vm11 = vcmp.gt.f32.partialorder %v3099_v52, 0.0  ;;  %v631_v51 = vmul.f32 1.442695, %v611_v29  ;;  %v3196_v35 = vadd.f32 %v562_v30, %v546_v16  ;;  %v1376_v16 = vld [vmem:[%s4083_s12 + $0x38] sm:$0xff] }
 0x14c   :  { %2123 = vmatpush.msrb.mxu3 %v3155_v40  ;;  %v2062_v6 = vadd.f32 -1.0, %v2174_v43  ;;  %vm597_vm12 = vcmp.gt.f32.partialorder %v3125_v8, 0.0  ;;  %v3201_v5 = vadd.f32 %v561_v38, %v545_v36  ;;  %v448_v46 = vmul.f32 %v432_v14, %v2944_v41  ;;  %v687_v38 = vld [vmem:[%s4084_s5] sm:$0xff]  ;;  %v1374_v43 = vld [vmem:[%s4083_s12 + $0x28] sm:$0xff] }
 0x14d   :  { %836 = vmatpush.msra.mxu1 %v3172_v28  ;;  %v2176_v54 = vpop.eup %2175  ;;  %v3207_v34 = vsel %vm599_vm10, %v3082_v57, %v2063_v24  ;;  %2179 = vpow2.f32 %v631_v51  ;;  %v610_v55 = vmin.f32 %v3196_v35, 0.0  ;;  %v447_v56 = vmul.f32 %v431_v22, %v2944_v41  ;;  %v1370_v57 = vld [vmem:[%s4083_s12 + $0x8] sm:$0xff]  ;;  %v699_v36 = vld [vmem:[%s4084_s5 + $0x60] sm:$0xff]  ;;  %v1379_v51 = vld [vmem:[%s4083_s12 + $0x50] sm:$0xff] }
 0x14e   :  { %2124 = vmatpush.msrb.mxu3 %v3172_v28  ;;  %v3216_v13 = vsel %vm598_vm11, %v3099_v52, %v2062_v6  ;;  %v2061_v10 = vadd.f32 -1.0, %v2176_v54  ;;  %v609_v17 = vmin.f32 %v3201_v5, 0.0  ;;  %v560_v41 = vmul.f32 %v432_v14, %v2774_v48  ;;  %v1367_v48 = vld [vmem:[%s4082_s11 + $0x70] sm:$0xff]  ;;  %v700_v6 = vld [vmem:[%s4084_s5 + $0x68] sm:$0xff]  ;;  %v1368_v54 = vld [vmem:[%s4082_s11 + $0x78] sm:$0xff] }
 0x14f   :  { %837 = vmatpush.msra.mxu1 %v3193_v53  ;;  %v629_v32 = vmul.f32 1.442695, %v610_v55  ;;  %v544_v7 = vsub.f32 %v471_v63, %v448_v46  ;;  %v543_v11 = vsub.f32 %v466_v59, %v447_v56  ;;  %v559_v26 = vmul.f32 %v431_v22, %v2780_v50  ;;  %v1375_v22 = vld [vmem:[%s4083_s12 + $0x30] sm:$0xff]  ;;  %v1377_v46 = vld [vmem:[%s4083_s12 + $0x40] sm:$0xff]  ;;  %v1380_v63 = vld [vmem:[%s4083_s12 + $0x58] sm:$0xff] }
 0x150   :  { %2125 = vmatpush.msrb.mxu3 %v3193_v53  ;;  %v2178_v33 = vpop.eup %2177  ;;  %v3229_v52 = vsel %vm597_vm12, %v3125_v8, %v2061_v10  ;;  %v627_v61 = vmul.f32 1.442695, %v609_v17  ;;  %vm596_vm13 = vcmp.gt.f32.partialorder %v3145_v47, 0.0  ;;  %vm595_vm14 = vcmp.gt.f32.partialorder %v3164_v21, 0.0  ;;  %v689_v55 = vld [vmem:[%s4084_s5 + $0x10] sm:$0xff]  ;;  %v1381_v59 = vld [vmem:[%s4083_s12 + $0x60] sm:$0xff] }
 0x151   :  { %1670 = vperm.xlu2 %2154, %v1366_v9   ;;  %1665 = vperm.xlu1 %2153, %v1365_v1   ;;  %v2060_v50 = vadd.f32 -1.0, %v2178_v33  ;;  %2181 = vpow2.f32 %v629_v32  ;;  %v576_v12 = vadd.f32 %v560_v41, %v544_v7  ;;  %v575_v60 = vadd.f32 %v559_v26, %v543_v11  ;;  %v1373_v9 = vld [vmem:[%s4083_s12 + $0x20] sm:$0xff]  ;;  %v1371_v1 = vld [vmem:[%s4083_s12 + $0x10] sm:$0xff]  ;;  %v1384_v10 = vld [vmem:[%s4083_s12 + $0x78] sm:$0xff] }
 0x152   :  { %1660 = vperm.xlu0 %2152, %v1364_v20   ;;  %838 = vmatpush.msra.mxu1 %v3207_v34  ;;  %2183 = vpow2.f32 %v627_v61  ;;  %vm594_vm15 = vcmp.gt.f32.partialorder %v3196_v35, 0.0  ;;  %vm593_vm0 = vcmp.gt.f32.partialorder %v3201_v5, 0.0  ;;  %v701_v56 = vld [vmem:[%s4084_s5 + $0x70] sm:$0xff]  ;;  %v702_v17 = vld [vmem:[%s4084_s5 + $0x78] sm:$0xff]  ;;  %v1382_v32 = vld [vmem:[%s4083_s12 + $0x68] sm:$0xff] }
 0x153   :  { %2126 = vmatpush.msrb.mxu3 %v3207_v34  ;;  %v2180_v8 = vpop.eup %2179  ;;  %v3241_v49 = vsel %vm596_vm13, %v3145_v47, %v2060_v50  ;;  %v608_v62 = vmin.f32 %v576_v12, 0.0  ;;  %v607_v42 = vmin.f32 %v575_v60, 0.0  ;;  %vm592_vm1 = vcmp.gt.f32.partialorder %v576_v12, 0.0  ;;  %v1383_v41 = vld [vmem:[%s4083_s12 + $0x70] sm:$0xff]  ;;  %v691_v7 = vld [vmem:[%s4084_s5 + $0x20] sm:$0xff]  ;;  %v692_v11 = vld [vmem:[%s4084_s5 + $0x28] sm:$0xff] }
 0x154   :  { %839 = vmatpush.msra.mxu1 %v3216_v13  ;;  %4109 = vst [vmem:[#allocation3_spill] sm:$0xff] %v3241_v49  ;;  %v2059_v15 = vadd.f32 -1.0, %v2180_v8  ;;  %vm591_vm2 = vcmp.gt.f32.partialorder %v575_v60, 0.0  ;;  %v693_v26 = vld [vmem:[%s4084_s5 + $0x30] sm:$0xff]  ;;  %v694_v33 = vld [vmem:[%s4084_s5 + $0x38] sm:$0xff] }
 0x155   :  { %2127 = vmatpush.msrb.mxu3 %v3216_v13  ;;  %v625_v18 = vmul.f32 1.442695, %v608_v62  ;;  %v623_v58 = vmul.f32 1.442695, %v607_v42  ;;  %v697_v61 = vld [vmem:[%s4084_s5 + $0x50] sm:$0xff]  ;;  %v698_v50 = vld [vmem:[%s4084_s5 + $0x58] sm:$0xff]  ;;  %v754_v62 = vpop.permute.xlu0 %753  ;;  %v759_v42 = vpop.permute.xlu1 %758 }
 0x156   :  { %840 = vmatpush.msra.mxu1 %v3229_v52  ;;  %v3247_v27 = vsel %vm595_vm14, %v3164_v21, %v2059_v15  ;;  %v1372_v21 = vld [vmem:[%s4083_s12 + $0x18] sm:$0xff] }
 0x157   :  { %2128 = vmatpush.msrb.mxu3 %v3229_v52  ;;  %4110 = vst [vmem:[#allocation4_spill] sm:$0xff] %v3247_v27  ;;  %v2182_v47 = vpop.eup %2181  ;;  %2185 = vpow2.f32 %v625_v18  ;;  %v764_v18 = vpop.permute.xlu2 %763 }
 0x158   :  { %841 = vmatpush.msra.mxu1 %v3241_v49  ;;  %v2184_v3 = vpop.eup %2183  ;;  %v2058_v19 = vadd.f32 -1.0, %v2182_v47  ;;  %2187 = vpow2.f32 %v623_v58 }
 0x159   :  { %1722 = vperm.xlu2 %2154, %v1370_v57   ;;  %1717 = vperm.xlu1 %2153, %v1369_v23   ;;  %v2057_v44 = vadd.f32 -1.0, %v2184_v3  ;;  %v690_v57 = vld [vmem:[%s4084_s5 + $0x18] sm:$0xff]  ;;  %v695_v23 = vld [vmem:[%s4084_s5 + $0x40] sm:$0xff] }
 0x15a   :  { %1675 = vperm.xlu0 %2152, %v1367_v48   ;;  %2129 = vmatpush.msrb.mxu3 %v3241_v49  ;;  %v3262_v20 = vsel %vm594_vm15, %v3196_v35, %v2058_v19  ;;  %v688_v35 = vld [vmem:[%s4084_s5 + $0x8] sm:$0xff] }
 0x15b   :  { %842 = vmatpush.msra.mxu1 %v3247_v27  ;;  %4111 = vst [vmem:[#allocation5_spill] sm:$0xff] %v3262_v20  ;;  %v3268_v24 = vsel %vm593_vm0, %v3201_v5, %v2057_v44  ;;  %v1378_v5 = vld [vmem:[%s4083_s12 + $0x48] sm:$0xff] }
 0x15c   :  { %2130 = vmatpush.msrb.mxu3 %v3247_v27  ;;  %4112 = vst [vmem:[#allocation6_spill] sm:$0xff] %v3268_v24  ;;  %v696_v48 = vld [vmem:[%s4084_s5 + $0x48] sm:$0xff] }
 0x15d   :  { %843 = vmatpush.msra.mxu1 %v3262_v20  ;;  %v2186_v25 = vpop.eup %2185  ;;  %v774_v47 = vpop.permute.xlu1 %773 }
 0x15e   :  { %2131 = vmatpush.msrb.mxu3 %v3262_v20  ;;  %v2188_v37 = vpop.eup %2187  ;;  %v2056_v39 = vadd.f32 -1.0, %v2186_v25 }
 0x15f   :  { %844 = vmatpush.msra.mxu1 %v3268_v24  ;;  %v2055_v29 = vadd.f32 -1.0, %v2188_v37  ;;  %v779_v3 = vpop.permute.xlu2 %778 }
 0x160   :  { %2132 = vmatpush.msrb.mxu3 %v3268_v24  ;;  %v3275_v30 = vsel %vm592_vm1, %v576_v12, %v2056_v39 }
 0x161   :  { %1737 = vperm.xlu2 %2154, %v1373_v9   ;;  %1732 = vperm.xlu1 %2153, %v1372_v21   ;;  %4113 = vst [vmem:[#allocation7_spill] sm:$0xff] %v3275_v30  ;;  %v3285_v14 = vsel %vm591_vm2, %v575_v60, %v2055_v29  ;;  %v769_v9 = vpop.permute.xlu0 %768 }
 0x162   :  { %1727 = vperm.xlu0 %2152, %v1371_v1   ;;  %845 = vmatpush.msra.mxu1 %v3275_v30  ;;  %4114 = vst [vmem:[#allocation8_spill] sm:$0xff] %v3285_v14 }
 0x163   :  { %2133 = vmatpush.msrb.mxu3 %v3275_v30 }
 0x164   :  { %846 = vmatpush.msra.mxu1 %v3285_v14 }
 0x165   :  { %2134 = vmatpush.msrb.mxu3 %v3285_v14  ;;  %847 = vmatmul.f32.vlgmr.msra.gmra.mxu1 %v687_v38  ;;  %v789_v21 = vpop.permute.xlu1 %788 }
 0x166   :  { %883 = vmatmul.f32.vlgmr.msrb.gmra.mxu3 %v699_v36 }
 0x167   :  { %v794_v1 = vpop.permute.xlu2 %793 }
 0x169   :  { %1752 = vperm.xlu2 %2154, %v1376_v16   ;;  %1747 = vperm.xlu1 %2153, %v1375_v22   ;;  %v784_v44 = vpop.permute.xlu0 %783 }
 0x16a   :  { %1742 = vperm.xlu0 %2152, %v1374_v43  }
 0x16d   :  { %850 = vmatmul.f32.gmra.mxu1 %v688_v35  ;;  %v804_v39 = vpop.permute.xlu1 %803 }
 0x16e   :  { %886 = vmatmul.f32.gmra.mxu3 %v700_v6 }
 0x16f   :  { %v809_v16 = vpop.permute.xlu2 %808 }
 0x171   :  { %1767 = vperm.xlu2 %2154, %v1379_v51   ;;  %1762 = vperm.xlu1 %2153, %v1378_v5   ;;  %v799_v37 = vpop.permute.xlu0 %798 }
 0x172   :  { %1757 = vperm.xlu0 %2152, %v1377_v46  }
 0x175   :  { %853 = vmatmul.f32.gmra.mxu1 %v689_v55  ;;  %v819_v43 = vpop.permute.xlu1 %818 }
 0x176   :  { %889 = vmatmul.f32.gmra.mxu3 %v701_v56 }
 0x177   :  { %v824_v35 = vpop.permute.xlu2 %823 }
 0x179   :  { %1680 = vperm.xlu2 %2154, %v1368_v54   ;;  %1777 = vperm.xlu1 %2153, %v1381_v59   ;;  %v814_v38 = vpop.permute.xlu0 %813 }
 0x17a   :  { %1772 = vperm.xlu0 %2152, %v1380_v63  }
 0x17d   :  { %856 = vmatmul.f32.gmra.mxu1 %v690_v57 }
 0x17e   :  { %892 = vmatmul.f32.gmra.mxu3 %v702_v17 }
 0x181   :  { %1792 = vperm.xlu2 %2154, %v1384_v10   ;;  %1787 = vperm.xlu1 %2153, %v1383_v41   ;;  %v829_v55 = vpop.permute.xlu0 %828 }
 0x182   :  { %1782 = vperm.xlu0 %2152, %v1382_v32  }
 0x185   :  { %859 = vmatmul.f32.gmra.mxu1 %v691_v7 }
 0x18d   :  { %862 = vmatmul.f32.gmra.mxu1 %v692_v11 }
 0x195   :  { %865 = vmatmul.f32.gmra.mxu1 %v693_v26  ;;  %v3387_v26 = vpop.permute.xlu1 %971 }
 0x19d   :  { %868 = vmatmul.f32.gmra.mxu1 %v694_v33 }
 0x1a5   :  { %871 = vmatmul.f32.gmra.mxu1 %v695_v23 }
 0x1ad   :  { %874 = vmatmul.f32.gmra.mxu1 %v696_v48 }
 0x1b5   :  { %877 = vmatmul.f32.gmra.mxu1 %v697_v61 }
 0x1bd   :  { %880 = vmatmul.f32.gmra.mxu1 %v698_v50  ;;  %v3394_v50 = vpop.permute.xlu2 %976 }
 0x1e2   :  { %v848_v12 = vpop.f32.mrf.mxu1 }
 0x1e3   :  { %v3366_v6 = vadd.f32 %v848_v12, %v754_v62 }
 0x1e5   :  { %4115 = vst [vmem:[#allocation9_spill] sm:$0xff] %v3366_v6  ;;  %v918_v56 = vmul.f32 %v3366_v6, %v3366_v6 }
 0x1e9   :  { %v884_v36 = vpop.f32.mrf.mxu3 }
 0x1ea   :  { %v851_v60 = vpop.f32.mrf.mxu1 }
 0x1eb   :  { %v3364_v51 = vadd.f32 %v851_v60, %v759_v42 }
 0x1ed   :  { %v919_v46 = vmul.f32 %v3364_v51, %v3364_v51  ;;  %v896_v59 = vadd.f32 %v3364_v51, %v3366_v6 }
 0x1ef   :  { %v934_v41 = vadd.f32 %v919_v46, %v918_v56 }
 0x1f1   :  { %v887_v57 = vpop.f32.mrf.mxu3 }
 0x1f2   :  { %v854_v8 = vpop.f32.mrf.mxu1 }
 0x1f3   :  { %v3368_v5 = vadd.f32 %v854_v8, %v764_v18 }
 0x1f5   :  { %v920_v63 = vmul.f32 %v3368_v5, %v3368_v5  ;;  %v897_v32 = vadd.f32 %v896_v59, %v3368_v5 }
 0x1f7   :  { %v935_v33 = vadd.f32 %v934_v41, %v920_v63 }
 0x1fa   :  { %v857_v15 = vpop.f32.mrf.mxu1 }
 0x1fb   :  { %v3372_v54 = vadd.f32 %v857_v15, %v769_v9 }
 0x1fd   :  { %v921_v7 = vmul.f32 %v3372_v54, %v3372_v54  ;;  %v898_v23 = vadd.f32 %v897_v32, %v3372_v54 }
 0x1ff   :  { %v936_v12 = vadd.f32 %v935_v33, %v921_v7 }
 0x202   :  { %v860_v58 = vpop.f32.mrf.mxu1 }
 0x203   :  { %v3380_v10 = vadd.f32 %v860_v58, %v774_v47 }
 0x205   :  { %v922_v48 = vmul.f32 %v3380_v10, %v3380_v10  ;;  %v899_v60 = vadd.f32 %v898_v23, %v3380_v10  ;;  %v3428_v23 = vadd.f32 %v884_v36, %v814_v38 }
 0x207   :  { %v937_v15 = vadd.f32 %v936_v12, %v922_v48  ;;  %v930_v38 = vmul.f32 %v3428_v23, %v3428_v23 }
 0x20a   :  { %v863_v19 = vpop.f32.mrf.mxu1 }
 0x20b   :  { %v3385_v11 = vadd.f32 %v863_v19, %v779_v3 }
 0x20d   :  { %v923_v8 = vmul.f32 %v3385_v11, %v3385_v11  ;;  %v900_v42 = vadd.f32 %v899_v60, %v3385_v11  ;;  %v3433_v60 = vadd.f32 %v887_v57, %v819_v43 }
 0x20f   :  { %v938_v47 = vadd.f32 %v937_v15, %v923_v8  ;;  %v931_v43 = vmul.f32 %v3433_v60, %v3433_v60 }
 0x212   :  { %v866_v25 = vpop.f32.mrf.mxu1 }
 0x213   :  { %v3392_v61 = vadd.f32 %v866_v25, %v784_v44  ;;  %v3411_v25 = vpop.permute.xlu0 %981 }
 0x215   :  { %v924_v18 = vmul.f32 %v3392_v61, %v3392_v61  ;;  %v901_v3 = vadd.f32 %v900_v42, %v3392_v61 }
 0x21a   :  { %v869_v29 = vpop.f32.mrf.mxu1 }
 0x21b   :  { %v3399_v62 = vadd.f32 %v869_v29, %v789_v21  ;;  %v890_v21 = vpop.f32.mrf.mxu3  ;;  %v939_v29 = vadd.f32 %v938_v47, %v924_v18  ;;  %v3438_v18 = vpop.permute.xlu0 %996 }
 0x21c   :  { %v3442_v36 = vadd.f32 %v890_v21, %v824_v35 }
 0x21d   :  { %v925_v19 = vmul.f32 %v3399_v62, %v3399_v62  ;;  %v902_v46 = vadd.f32 %v901_v3, %v3399_v62 }
 0x21f   :  { %v940_v59 = vadd.f32 %v939_v29, %v925_v19 }
 0x222   :  { %v872_v22 = vpop.f32.mrf.mxu1 }
 0x223   :  { %v3404_v9 = vadd.f32 %v872_v22, %v794_v1  ;;  %v3418_v22 = vpop.permute.xlu1 %986 }
 0x225   :  { %v926_v56 = vmul.f32 %v3404_v9, %v3404_v9  ;;  %v903_v63 = vadd.f32 %v902_v46, %v3404_v9 }
 0x227   :  { %v941_v41 = vadd.f32 %v940_v59, %v926_v56  ;;  %v932_v56 = vmul.f32 %v3442_v36, %v3442_v36 }
 0x22a   :  { %v875_v17 = vpop.f32.mrf.mxu1 }
 0x22b   :  { %v3409_v44 = vadd.f32 %v875_v17, %v799_v37  ;;  %v3423_v17 = vpop.permute.xlu2 %991  ;;  %v3445_v3 = vpop.permute.xlu1 %1001 }
 0x22d   :  { %v927_v37 = vmul.f32 %v3409_v44, %v3409_v44  ;;  %v904_v32 = vadd.f32 %v903_v63, %v3409_v44 }
 0x232   :  { %v878_v58 = vpop.f32.mrf.mxu1 }
 0x233   :  { %v3416_v1 = vadd.f32 %v878_v58, %v804_v39  ;;  %v942_v39 = vadd.f32 %v941_v41, %v927_v37  ;;  %v893_v58 = vpop.f32.mrf.mxu3  ;;  %v3450_v46 = vpop.permute.xlu2 %1006 }
 0x234   :  { %v894_v57 = vadd.f32 %v893_v58, %v829_v55  ;;  %v1042_v55 = vpop.permute.xlu1 %1041 }
 0x235   :  { %v928_v7 = vmul.f32 %v3416_v1, %v3416_v1  ;;  %v905_v48 = vadd.f32 %v904_v32, %v3416_v1 }
 0x236   :  { %v933_v59 = vmul.f32 %v894_v57, %v894_v57 }
 0x237   :  { %v943_v8 = vadd.f32 %v942_v39, %v928_v7  ;;  %v1047_v7 = vpop.permute.xlu0 %1046 }
 0x23a   :  { %v881_v33 = vpop.f32.mrf.mxu1 }
 0x23b   :  { %v3431_v12 = vadd.f32 %v881_v33, %v809_v16 }
 0x23d   :  { %v906_v15 = vadd.f32 %v905_v48, %v3431_v12  ;;  %v929_v42 = vmul.f32 %v3431_v12, %v3431_v12 }
 0x23f   :  { %v907_v47 = vadd.f32 %v906_v15, %v3428_v23  ;;  %v944_v16 = vadd.f32 %v943_v8, %v929_v42  ;;  %v1037_v15 = vpop.permute.xlu2 %1036 }
 0x241   :  { %v908_v19 = vadd.f32 %v907_v47, %v3433_v60  ;;  %v945_v29 = vadd.f32 %v944_v16, %v930_v38 }
 0x243   :  { %v909_v35 = vadd.f32 %v908_v19, %v3442_v36  ;;  %v946_v21 = vadd.f32 %v945_v29, %v931_v43  ;;  %v1159_v19 = vpop.permute.xlu0 %1158 }
 0x245   :  { %v910_v63 = vadd.f32 %v909_v35, %v894_v57  ;;  %v947_v37 = vadd.f32 %v946_v21, %v932_v56  ;;  %v1032_v56 = vpop.permute.xlu1 %1031 }
 0x247   :  { %v911_v41 = vrot.slane %v910_v63, 4  ;;  %v948_v32 = vadd.f32 %v947_v37, %v933_v59  ;;  %v1154_v59 = vpop.permute.xlu2 %1153 }
 0x249   :  { %v912_v33 = vadd.f32 %v911_v41, %v910_v63  ;;  %v949_v39 = vrot.slane %v948_v32, 4 }
 0x24b   :  { %v913_v48 = vrot.slane %v912_v33, 2  ;;  %v950_v8 = vadd.f32 %v949_v39, %v948_v32  ;;  %v1027_v41 = vpop.permute.xlu0 %1026 }
 0x24d   :  { %v914_v42 = vadd.f32 %v913_v48, %v912_v33  ;;  %v951_v58 = vrot.slane %v950_v8, 2  ;;  %v1149_v32 = vpop.permute.xlu1 %1148 }
 0x24f   :  { %v915_v38 = vrot.slane %v914_v42, 1  ;;  %v952_v47 = vadd.f32 %v951_v58, %v950_v8  ;;  %v1022_v39 = vpop.permute.xlu2 %1021 }
 0x251   :  { %v916_v16 = vadd.f32 %v915_v38, %v914_v42  ;;  %v953_v4 = vrot.slane %v952_v47, 1 }
 0x253   :  { %v3455_v43 = vmul.f32 0.03125, %v916_v16  ;;  %v954_v29 = vadd.f32 %v953_v4, %v952_v47  ;;  %v1144_v42 = vpop.permute.xlu0 %1143 }
 0x255   :  { %v955_v35 = vmul.f32 0.03125, %v954_v29  ;;  %v956_v21 = vmul.f32 %v3455_v43, %v3455_v43  ;;  %v1017_v4 = vpop.permute.xlu1 %1016 }
 0x257   :  { %v957_v63 = vsub.f32 %v955_v35, %v956_v21  ;;  %v1139_v16 = vpop.permute.xlu2 %1138 }
 0x259   :  { %v958_v37 = vadd.f32 1e-05, %v957_v63 }
 0x25b   :  { %2189 = vrsqrt.f32 %v958_v37  ;;  %vm965_vm4 = vweird.f32 %v958_v37 }
 0x25d   :  { %v1134_v49 = vpop.permute.xlu1 %1133 }
 0x261   :  { %v2190_v33 = vpop.eup %2189 }
 0x262   :  { %v960_v48 = vmul.f32 %v2190_v33, %v958_v37  ;;  %vm966_vm3 = vweird.f32 %v2190_v33 }
 0x263   :  { %vm967_vm5 = vmor %vm965_vm4, %vm966_vm3 }
 0x264   :  { %v961_v8 = vmul.f32 %v2190_v33, %v960_v48 }
 0x266   :  { %v962_v58 = vmul.f32 0.5, %v961_v8 }
 0x268   :  { %v963_v38 = vsub.f32 1.5, %v962_v58 }
 0x26a   :  { %v964_v47 = vmul.f32 %v2190_v33, %v963_v38 }
 0x26c   :  { %v3459_v29 = vsel %vm967_vm5, %v2190_v33, %v964_v47  ;;  %v1012_v33 = vpop.permute.xlu0 %1011 }
 0x26d   :  { %v1060_v35 = vmul.f32 %v1027_v41, %v3459_v29  ;;  %v1064_v21 = vmul.f32 %v1047_v7, %v3459_v29  ;;  %v1063_v63 = vmul.f32 %v1042_v55, %v3459_v29  ;;  %v1062_v14 = vmul.f32 %v1037_v15, %v3459_v29 }
 0x26e   :  { %v1061_v48 = vmul.f32 %v1032_v56, %v3459_v29  ;;  %v1059_v8 = vmul.f32 %v1022_v39, %v3459_v29  ;;  %v1058_v38 = vmul.f32 %v1017_v4, %v3459_v29 }
 0x26f   :  { %v1076_v58 = vmul.f32 %v1060_v35, %v3455_v43  ;;  %v1080_v37 = vmul.f32 %v1064_v21, %v3455_v43  ;;  %v1188_v47 = vmul.f32 %v1060_v35, %v3431_v12  ;;  %v1192_v41 = vmul.f32 %v1064_v21, %v894_v57 }
 0x270   :  { %v1079_v7 = vmul.f32 %v1063_v63, %v3455_v43  ;;  %v1078_v55 = vmul.f32 %v1062_v14, %v3455_v43  ;;  %v1191_v56 = vmul.f32 %v1063_v63, %v3442_v36  ;;  %v1077_v39 = vmul.f32 %v1061_v48, %v3455_v43 }
 0x271   :  { %v1172_v30 = vsub.f32 %v1139_v16, %v1076_v58  ;;  %v1176_v15 = vsub.f32 %v1159_v19, %v1080_v37  ;;  %v1190_v27 = vmul.f32 %v1062_v14, %v3433_v60  ;;  %v1075_v4 = vmul.f32 %v1059_v8, %v3455_v43 }
 0x272   :  { %v1175_v24 = vsub.f32 %v1154_v59, %v1079_v7  ;;  %v1174_v20 = vsub.f32 %v1149_v32, %v1078_v55  ;;  %v1173_v57 = vsub.f32 %v1144_v42, %v1077_v39  ;;  %v1189_v35 = vmul.f32 %v1061_v48, %v3428_v23  ;;  %v1129_v32 = vpop.permute.xlu2 %1128 }
 0x273   :  { %v3477_v6 = vadd.f32 %v1188_v47, %v1172_v30  ;;  %v3479_v12 = vadd.f32 %v1192_v41, %v1176_v15  ;;  %v1171_v36 = vsub.f32 %v1134_v49, %v1075_v4  ;;  %v1057_v59 = vmul.f32 %v1012_v33, %v3459_v29 }
 0x274   :  { %v3482_v16 = vadd.f32 %v1191_v56, %v1175_v24  ;;  %v3484_v19 = vadd.f32 %v1190_v27, %v1174_v20  ;;  %v3489_v21 = vadd.f32 %v1189_v35, %v1173_v57  ;;  %v1074_v30 = vmul.f32 %v1058_v38, %v3455_v43  ;;  %v1124_v7 = vpop.permute.xlu0 %1123 }
 0x275   :  { %v1236_v14 = vmin.f32 %v3477_v6, 0.0  ;;  %v1240_v60 = vmin.f32 %v3479_v12, 0.0  ;;  %v1187_v24 = vmul.f32 %v1059_v8, %v3416_v1  ;;  %v1186_v20 = vmul.f32 %v1058_v38, %v3409_v44 }
 0x276   :  { %v1239_v42 = vmin.f32 %v3482_v16, 0.0  ;;  %v1238_v23 = vmin.f32 %v3484_v19, 0.0  ;;  %v1237_v49 = vmin.f32 %v3489_v21, 0.0  ;;  %v1170_v47 = vsub.f32 %v1129_v32, %v1074_v30 }
 0x277   :  { %v1271_v27 = vmul.f32 1.442695, %v1240_v60  ;;  %v1263_v58 = vmul.f32 1.442695, %v1236_v14  ;;  %v3497_v37 = vadd.f32 %v1187_v24, %v1171_v36  ;;  %v1073_v41 = vmul.f32 %v1057_v59, %v3455_v43 }
 0x278   :  { %v1269_v63 = vmul.f32 1.442695, %v1239_v42  ;;  %v1267_v48 = vmul.f32 1.442695, %v1238_v23  ;;  %v1265_v33 = vmul.f32 1.442695, %v1237_v49  ;;  %v1185_v1 = vmul.f32 %v1057_v59, %v3404_v9  ;;  %v1119_v59 = vpop.permute.xlu1 %1118 }
 0x279   :  { %2191 = vpow2.f32 %v1271_v27  ;;  %v1235_v55 = vmin.f32 %v3497_v37, 0.0  ;;  %v3502_v8 = vadd.f32 %v1186_v20, %v1170_v47  ;;  %v1169_v44 = vsub.f32 %v1124_v7, %v1073_v41 }
 0x27a   :  { %2193 = vpow2.f32 %v1269_v63  ;;  %v1056_v38 = vmul.f32 %v3450_v46, %v3459_v29  ;;  %vm1224_vm6 = vcmp.gt.f32.partialorder %v3479_v12, 0.0  ;;  %v1055_v56 = vmul.f32 %v3445_v3, %v3459_v29  ;;  %v1114_v36 = vpop.permute.xlu2 %1113 }
 0x27b   :  { %2195 = vpow2.f32 %v1267_v48  ;;  %v1261_v15 = vmul.f32 1.442695, %v1235_v55  ;;  %v1234_v39 = vmin.f32 %v3502_v8, 0.0  ;;  %v3510_v4 = vadd.f32 %v1185_v1, %v1169_v44 }
 0x27c   :  { %2197 = vpow2.f32 %v1265_v33  ;;  %v1054_v9 = vmul.f32 %v3438_v18, %v3459_v29  ;;  %vm1223_vm7 = vcmp.gt.f32.partialorder %v3482_v16, 0.0  ;;  %v1072_v46 = vmul.f32 %v1056_v38, %v3455_v43  ;;  %v1109_v1 = vpop.permute.xlu0 %1108 }
 0x27d   :  { %2199 = vpow2.f32 %v1263_v58  ;;  %v1071_v57 = vmul.f32 %v1055_v56, %v3455_v43  ;;  %vm1222_vm8 = vcmp.gt.f32.partialorder %v3484_v19, 0.0  ;;  %v1259_v3 = vmul.f32 1.442695, %v1234_v39 }
 0x27e   :  { %2201 = vpow2.f32 %v1261_v15  ;;  %v1233_v32 = vmin.f32 %v3510_v4, 0.0  ;;  %v1184_v14 = vmul.f32 %v1056_v38, %v3399_v62  ;;  %v1168_v18 = vsub.f32 %v1119_v59, %v1072_v46 }
 0x27f   :  { %v2192_v35 = vpop.eup %2191  ;;  %v1167_v42 = vsub.f32 %v1114_v36, %v1071_v57  ;;  %v1183_v23 = vmul.f32 %v1055_v56, %v3392_v61  ;;  %2203 = vpow2.f32 %v1259_v3  ;;  %v1070_v20 = vmul.f32 %v1054_v9, %v3455_v43 }
 0x280   :  { %v2194_v60 = vpop.eup %2193  ;;  %v2086_v30 = vadd.f32 -1.0, %v2192_v35  ;;  %v1257_v49 = vmul.f32 1.442695, %v1233_v32  ;;  %v3525_v33 = vadd.f32 %v1184_v14, %v1168_v18  ;;  %vm1221_vm9 = vcmp.gt.f32.partialorder %v3489_v21, 0.0  ;;  %v1104_v3 = vpop.permute.xlu1 %1103 }
 0x281   :  { %v2196_v24 = vpop.eup %2195  ;;  %v2085_v27 = vadd.f32 -1.0, %v2194_v60  ;;  %v3527_v62 = vadd.f32 %v1183_v23, %v1167_v42  ;;  %vm1220_vm10 = vcmp.gt.f32.partialorder %v3477_v6, 0.0  ;;  %vm1219_vm11 = vcmp.gt.f32.partialorder %v3497_v37, 0.0 }
 0x282   :  { %v2198_v63 = vpop.eup %2197  ;;  %v1304_v48 = vsel %vm1224_vm6, %v3479_v12, %v2086_v30  ;;  %v2084_v58 = vadd.f32 -1.0, %v2196_v24  ;;  %2205 = vpow2.f32 %v1257_v49  ;;  %v1232_v38 = vmin.f32 %v3525_v33, 0.0 }
 0x283   :  { %v2200_v47 = vpop.eup %2199  ;;  %v3530_v41 = vadd.f32 %v1304_v48, %v3105_v45  ;;  %v1303_v61 = vsel %vm1223_vm7, %v3482_v16, %v2085_v27  ;;  %v2083_v7 = vadd.f32 -1.0, %v2198_v63  ;;  %vm1218_vm12 = vcmp.gt.f32.partialorder %v3502_v8, 0.0 }
 0x284   :  { %v2202_v55 = vpop.eup %2201  ;;  %v1302_v12 = vsel %vm1222_vm8, %v3484_v19, %v2084_v58  ;;  %v2082_v44 = vadd.f32 -1.0, %v2200_v47  ;;  %v3543_v45 = vadd.f32 %v1303_v61, %v3121_v0  ;;  %v1231_v19 = vmin.f32 %v3527_v62, 0.0  ;;  %v1094_v49 = vpop.permute.xlu0 %1093 }
 0x285   :  { %4116 = vst [vmem:[#allocation10_spill] sm:$0xff] %v3530_v41  ;;  %1465 = vmatpush.msra.mxu2 %v3530_v41  ;;  %2135 = vmatpush.msra.mxu3 %v3530_v41  ;;  %v1301_v16 = vsel %vm1221_vm9, %v3489_v21, %v2083_v7  ;;  %v2081_v15 = vadd.f32 -1.0, %v2202_v55  ;;  %v1182_v56 = vmul.f32 %v1054_v9, %v3385_v11  ;;  %v2204_v39 = vpop.eup %2203  ;;  %v1255_v46 = vmul.f32 1.442695, %v1232_v38 }
 0x286   :  { %4117 = vst [vmem:[#allocation11_spill] sm:$0xff] %v3543_v45  ;;  %v3554_v0 = vadd.f32 %v1302_v12, %v3134_v31  ;;  %v3557_v21 = vadd.f32 %v1301_v16, %v3143_v2  ;;  %v1166_v57 = vsub.f32 %v1109_v1, %v1070_v20  ;;  %v1300_v35 = vsel %vm1220_vm10, %v3477_v6, %v2082_v44 }
 0x287   :  { %1466 = vmatpush.msra.mxu2 %v3543_v45  ;;  %2136 = vmatpush.msra.mxu3 %v3543_v45  ;;  %v2080_v36 = vadd.f32 -1.0, %v2204_v39  ;;  %v1253_v59 = vmul.f32 1.442695, %v1231_v19  ;;  %v1053_v11 = vmul.f32 %v3423_v17, %v3459_v29  ;;  %2207 = vpow2.f32 %v1255_v46 }
 0x288   :  { %4118 = vst [vmem:[#allocation12_spill] sm:$0xff] %v3554_v0  ;;  %v2206_v9 = vpop.eup %2205  ;;  %v3566_v31 = vadd.f32 %v1182_v56, %v1166_v57  ;;  %v1052_v2 = vmul.f32 %v3418_v22, %v3459_v29  ;;  %v1051_v6 = vmul.f32 %v3411_v25, %v3459_v29  ;;  %v1299_v32 = vsel %vm1219_vm11, %v3497_v37, %v2081_v15  ;;  %v1099_v22 = vpop.permute.xlu2 %1098 }
 0x289   :  { %4119 = vst [vmem:[#allocation13_spill] sm:$0xff] %v3557_v21  ;;  %1467 = vmatpush.msra.mxu2 %v3554_v0  ;;  %2137 = vmatpush.msra.mxu3 %v3554_v0  ;;  %v2079_v17 = vadd.f32 -1.0, %v2206_v9  ;;  %2209 = vpow2.f32 %v1253_v59  ;;  %v1069_v14 = vmul.f32 %v1053_v11, %v3455_v43  ;;  %v3579_v60 = vadd.f32 %v1300_v35, %v3155_v40  ;;  %v1089_v16 = vpop.permute.xlu1 %1088  ;;  %v4124_v9 = vld [vmem:[#allocation3_spill] sm:$0xff] }
 0x28a   :  { %vm1217_vm13 = vcmp.gt.f32.partialorder %v3510_v4, 0.0  ;;  %vm1216_vm14 = vcmp.gt.f32.partialorder %v3525_v33, 0.0  ;;  %v1230_v25 = vmin.f32 %v3566_v31, 0.0  ;;  %v1298_v37 = vsel %vm1218_vm12, %v3502_v8, %v2080_v36  ;;  %v4123_v36 = vld [vmem:[#allocation9_spill] sm:$0xff] }
 0x28b   :  { %1468 = vmatpush.msra.mxu2 %v3557_v21  ;;  %2138 = vmatpush.msra.mxu3 %v3557_v21  ;;  %4120 = vst [vmem:[#allocation14_spill] sm:$0xff] %v3579_v60  ;;  %v1165_v30 = vsub.f32 %v1104_v3, %v1069_v14  ;;  %v1181_v18 = vmul.f32 %v1053_v11, %v3380_v10  ;;  %vm1215_vm15 = vcmp.gt.f32.partialorder %v3527_v62, 0.0  ;;  %vm1214_vm0 = vcmp.gt.f32.partialorder %v3566_v31, 0.0 }
 0x28c   :  { %v1068_v42 = vmul.f32 %v1052_v2, %v3455_v43  ;;  %v3592_v40 = vadd.f32 %v1299_v32, %v3172_v28  ;;  %v1297_v23 = vsel %vm1217_vm13, %v3510_v4, %v2079_v17  ;;  %v1251_v24 = vmul.f32 1.442695, %v1230_v25 }
 0x28d   :  { %1469 = vmatpush.msra.mxu2 %v3579_v60  ;;  %2139 = vmatpush.msra.mxu3 %v3579_v60  ;;  %v1067_v27 = vmul.f32 %v1051_v6, %v3455_v43  ;;  %v3596_v20 = vadd.f32 %v1181_v18, %v1165_v30  ;;  %v1180_v10 = vmul.f32 %v1052_v2, %v3372_v54  ;;  %v2208_v48 = vpop.eup %2207  ;;  %v4125_v30 = vld [vmem:[#allocation4_spill] sm:$0xff] }
 0x28e   :  { %4121 = vst [vmem:[#allocation15_spill] sm:$0xff] %v3592_v40  ;;  %v1164_v8 = vsub.f32 %v1099_v22, %v1068_v42  ;;  %v1050_v63 = vmul.f32 %v3394_v50, %v3459_v29  ;;  %v3604_v28 = vadd.f32 %v1298_v37, %v3193_v53  ;;  %2211 = vpow2.f32 %v1251_v24  ;;  %v4126_v24 = vld [vmem:[#allocation5_spill] sm:$0xff] }
 0x28f   :  { %1470 = vmatpush.msra.mxu2 %v3592_v40  ;;  %2140 = vmatpush.msra.mxu3 %v3592_v40  ;;  %v1163_v4 = vsub.f32 %v1094_v49, %v1067_v27  ;;  %v1179_v58 = vmul.f32 %v1051_v6, %v3368_v5  ;;  %v2210_v47 = vpop.eup %2209  ;;  %v3608_v61 = vadd.f32 %v1297_v23, %v3207_v34  ;;  %v2078_v54 = vadd.f32 -1.0, %v2208_v48 }
 0x290   :  { %4122 = vst [vmem:[#allocation16_spill] sm:$0xff] %v3604_v28  ;;  %v1229_v7 = vmin.f32 %v3596_v20, 0.0  ;;  %v1196_v50 = vadd.f32 %v1180_v10, %v1164_v8  ;;  %v2077_v55 = vadd.f32 -1.0, %v2210_v47  ;;  %v1066_v53 = vmul.f32 %v1050_v63, %v3455_v43  ;;  %v1084_v57 = vpop.permute.xlu2 %1083 }
 0x291   :  { %1471 = vmatpush.msra.mxu2 %v3604_v28  ;;  %2141 = vmatpush.msra.mxu3 %v3604_v28  ;;  %v1195_v1 = vadd.f32 %v1179_v58, %v1163_v4  ;;  %v1049_v12 = vmul.f32 %v3387_v26, %v3459_v29  ;;  %v1296_v34 = vsel %vm1216_vm14, %v3525_v33, %v2078_v54  ;;  %vm1213_vm1 = vcmp.gt.f32.partialorder %v3596_v20, 0.0  ;;  %v4128_v58 = vld [vmem:[#allocation7_spill] sm:$0xff] }
 0x292   :  { %v1249_v5 = vmul.f32 1.442695, %v1229_v7  ;;  %v1228_v44 = vmin.f32 %v1196_v50, 0.0  ;;  %v3623_v38 = vadd.f32 %v1296_v34, %v3216_v13  ;;  %v1295_v15 = vsel %vm1215_vm15, %v3527_v62, %v2077_v55  ;;  %v1334_v34 = vld [vmem:[%s4085_s9 + $0x68] sm:$0xff] }
 0x293   :  { %1472 = vmatpush.msra.mxu2 %v3608_v61  ;;  %2142 = vmatpush.msra.mxu3 %v3608_v61  ;;  %v1227_v19 = vmin.f32 %v1195_v1, 0.0  ;;  %v1162_v29 = vsub.f32 %v1089_v16, %v1066_v53  ;;  %v1178_v33 = vmul.f32 %v1050_v63, %v3364_v51  ;;  %v3630_v39 = vadd.f32 %v1295_v15, %v3229_v52  ;;  %v1333_v53 = vld [vmem:[%s4085_s9 + $0x60] sm:$0xff]  ;;  %v1324_v16 = vld [vmem:[%s4085_s9 + $0x18] sm:$0xff] }
 0x294   :  { %2213 = vpow2.f32 %v1249_v5  ;;  %v1247_v26 = vmul.f32 1.442695, %v1228_v44  ;;  %v2212_v56 = vpop.eup %2211  ;;  %v1065_v13 = vmul.f32 %v1049_v12, %v3455_v43  ;;  %v1177_v59 = vmul.f32 %v1049_v12, %v4123_v36  ;;  %v1322_v12 = vld [vmem:[%s4085_s9 + $0x8] sm:$0xff]  ;;  %v1323_v5 = vld [vmem:[%s4085_s9 + $0x10] sm:$0xff]  ;;  %v1336_v15 = vld [vmem:[%s4085_s9 + $0x78] sm:$0xff] }
 0x295   :  { %1473 = vmatpush.msra.mxu2 %v3623_v38  ;;  %2143 = vmatpush.msra.mxu3 %v3623_v38  ;;  %v1245_v46 = vmul.f32 1.442695, %v1227_v19  ;;  %v2076_v35 = vadd.f32 -1.0, %v2212_v56  ;;  %v1194_v62 = vadd.f32 %v1178_v33, %v1162_v29  ;;  %vm1212_vm2 = vcmp.gt.f32.partialorder %v1196_v50, 0.0  ;;  %v1335_v44 = vld [vmem:[%s4085_s9 + $0x70] sm:$0xff]  ;;  %v1325_v19 = vld [vmem:[%s4085_s9 + $0x20] sm:$0xff] }
 0x296   :  { %2215 = vpow2.f32 %v1247_v26  ;;  %v1161_v51 = vsub.f32 %v1084_v57, %v1065_v13  ;;  %vm1211_vm3 = vcmp.gt.f32.partialorder %v1195_v1, 0.0  ;;  %v1326_v26 = vld [vmem:[%s4085_s9 + $0x28] sm:$0xff]  ;;  %v1327_v29 = vld [vmem:[%s4085_s9 + $0x30] sm:$0xff]  ;;  %v1328_v33 = vld [vmem:[%s4085_s9 + $0x38] sm:$0xff] }
 0x297   :  { %1474 = vmatpush.msra.mxu2 %v3630_v39  ;;  %2144 = vmatpush.msra.mxu3 %v3630_v39  ;;  %2217 = vpow2.f32 %v1245_v46  ;;  %v1294_v52 = vsel %vm1214_vm0, %v3566_v31, %v2076_v35  ;;  %v1226_v11 = vmin.f32 %v1194_v62, 0.0  ;;  %vm1210_vm4 = vcmp.gt.f32.partialorder %v1194_v62, 0.0  ;;  %v1329_v56 = vld [vmem:[%s4085_s9 + $0x40] sm:$0xff]  ;;  %v1330_v46 = vld [vmem:[%s4085_s9 + $0x48] sm:$0xff]  ;;  %v1331_v13 = vld [vmem:[%s4085_s9 + $0x50] sm:$0xff] }
 0x298   :  { %v3639_v3 = vadd.f32 %v1294_v52, %v4124_v9  ;;  %v1193_v43 = vadd.f32 %v1177_v59, %v1161_v51  ;;  %v1332_v57 = vld [vmem:[%s4085_s9 + $0x58] sm:$0xff]  ;;  %v1393_v59 = vpop.permute.xlu1 %1392  ;;  %v1388_v52 = vpop.permute.xlu0 %1387 }
 0x299   :  { %v1243_v6 = vmul.f32 1.442695, %v1226_v11  ;;  %v1398_v11 = vpop.permute.xlu2 %1397 }
 0x29a   :  { %v2214_v2 = vpop.eup %2213  ;;  %1475 = vmatpush.msra.mxu2 %v3639_v3  ;;  %2145 = vmatpush.msra.mxu3 %v3639_v3  ;;  %v1225_v17 = vmin.f32 %v1193_v43, 0.0  ;;  %vm1209_vm5 = vcmp.gt.f32.partialorder %v1193_v43, 0.0 }
 0x29b   :  { %v2075_v32 = vadd.f32 -1.0, %v2214_v2  ;;  %2219 = vpow2.f32 %v1243_v6 }
 0x29c   :  { %v2216_v14 = vpop.eup %2215  ;;  %v1241_v37 = vmul.f32 1.442695, %v1225_v17 }
 0x29d   :  { %v2218_v25 = vpop.eup %2217  ;;  %v1293_v31 = vsel %vm1213_vm1, %v3596_v20, %v2075_v32  ;;  %v2074_v22 = vadd.f32 -1.0, %v2216_v14  ;;  %v4127_v20 = vld [vmem:[#allocation6_spill] sm:$0xff] }
 0x29e   :  { %v3646_v18 = vadd.f32 %v1293_v31, %v4125_v30  ;;  %v2073_v42 = vadd.f32 -1.0, %v2218_v25  ;;  %2221 = vpow2.f32 %v1241_v37 }
 0x29f   :  { %v1292_v23 = vsel %vm1212_vm2, %v1196_v50, %v2074_v22  ;;  %v4129_v50 = vld [vmem:[#allocation8_spill] sm:$0xff] }
 0x2a0   :  { %1476 = vmatpush.msra.mxu2 %v3646_v18  ;;  %2146 = vmatpush.msra.mxu3 %v3646_v18  ;;  %v3651_v27 = vadd.f32 %v1292_v23, %v4126_v24  ;;  %v1291_v49 = vsel %vm1211_vm3, %v1195_v1, %v2073_v42  ;;  %v1321_v1 = vld [vmem:[%s4085_s9] sm:$0xff]  ;;  %v1403_v2 = vpop.permute.xlu0 %1402 }
 0x2a1   :  { %v2220_v8 = vpop.eup %2219  ;;  %v3656_v10 = vadd.f32 %v1291_v49, %v4127_v20  ;;  %v1413_v6 = vpop.permute.xlu2 %1412 }
 0x2a2   :  { %1477 = vmatpush.msra.mxu2 %v3651_v27  ;;  %2147 = vmatpush.msra.mxu3 %v3651_v27  ;;  %v2072_v63 = vadd.f32 -1.0, %v2220_v8 }
 0x2a4   :  { %1478 = vmatpush.msra.mxu2 %v3656_v10  ;;  %2148 = vmatpush.msra.mxu3 %v3656_v10  ;;  %v2222_v48 = vpop.eup %2221  ;;  %v1290_v4 = vsel %vm1210_vm4, %v1194_v62, %v2072_v63 }
 0x2a5   :  { %v3661_v47 = vadd.f32 %v1290_v4, %v4128_v58  ;;  %v2071_v54 = vadd.f32 -1.0, %v2222_v48 }
 0x2a7   :  { %1479 = vmatpush.msra.mxu2 %v3661_v47  ;;  %2149 = vmatpush.msra.mxu3 %v3661_v47  ;;  %v1289_v7 = vsel %vm1209_vm5, %v1193_v43, %v2071_v54  ;;  %v1408_v43 = vpop.permute.xlu1 %1407 }
 0x2a8   :  { %v3666_v55 = vadd.f32 %v1289_v7, %v4129_v50  ;;  %v1418_v14 = vpop.permute.xlu0 %1417 }
 0x2a9   :  { %v1428_v31 = vpop.permute.xlu2 %1427 }
 0x2aa   :  { %1480 = vmatpush.msra.mxu2 %v3666_v55  ;;  %2150 = vmatpush.msra.mxu3 %v3666_v55 }
 0x2ab   :  { %1481 = vmatmul.f32.vlgmr.msra.gmra.mxu2 %v1321_v1  ;;  %1517 = vmatmul.f32.vlgmr.msra.gmra.mxu3 %v1333_v53 }
 0x2af   :  { %v1423_v17 = vpop.permute.xlu1 %1422 }
 0x2b0   :  { %v1433_v30 = vpop.permute.xlu0 %1432 }
 0x2b1   :  { %v1443_v42 = vpop.permute.xlu2 %1442 }
 0x2b3   :  { %1484 = vmatmul.f32.gmra.mxu2 %v1322_v12  ;;  %1520 = vmatmul.f32.gmra.mxu3 %v1334_v34 }
 0x2b7   :  { %v1438_v37 = vpop.permute.xlu1 %1437 }
 0x2b8   :  { %v1448_v20 = vpop.permute.xlu0 %1447 }
 0x2b9   :  { %v1458_v4 = vpop.permute.xlu2 %1457 }
 0x2bb   :  { %1487 = vmatmul.f32.gmra.mxu2 %v1323_v5  ;;  %1523 = vmatmul.f32.gmra.mxu3 %v1335_v44 }
 0x2bf   :  { %v1453_v8 = vpop.permute.xlu1 %1452 }
 0x2c3   :  { %1490 = vmatmul.f32.gmra.mxu2 %v1324_v16  ;;  %1526 = vmatmul.f32.gmra.mxu3 %v1336_v15 }
 0x2cb   :  { %1493 = vmatmul.f32.gmra.mxu2 %v1325_v19 }
 0x2d3   :  { %1496 = vmatmul.f32.gmra.mxu2 %v1326_v26 }
 0x2db   :  { %1499 = vmatmul.f32.gmra.mxu2 %v1327_v29 }
 0x2e3   :  { %1502 = vmatmul.f32.gmra.mxu2 %v1328_v33 }
 0x2eb   :  { %1505 = vmatmul.f32.gmra.mxu2 %v1329_v56  ;;  %v3746_v56 = vpop.permute.xlu1 %1605 }
 0x2f3   :  { %1508 = vmatmul.f32.gmra.mxu2 %v1330_v46  ;;  %v1463_v46 = vpop.permute.xlu0 %1462 }
 0x2fb   :  { %1511 = vmatmul.f32.gmra.mxu2 %v1331_v13 }
 0x303   :  { %1514 = vmatmul.f32.gmra.mxu2 %v1332_v57 }
 0x32e   :  { %v1482_v35 = vpop.f32.mrf.mxu2  ;;  %v1518_v23 = vpop.f32.mrf.mxu3 }
 0x32f   :  { %v3720_v63 = vadd.f32 %v1482_v35, %v1388_v52 }
 0x331   :  { %v1552_v7 = vmul.f32 %v3720_v63, %v3720_v63 }
 0x336   :  { %v1485_v62 = vpop.f32.mrf.mxu2  ;;  %v1521_v12 = vpop.f32.mrf.mxu3 }
 0x337   :  { %v3718_v49 = vadd.f32 %v1485_v62, %v1393_v59 }
 0x339   :  { %v1553_v58 = vmul.f32 %v3718_v49, %v3718_v49  ;;  %v1530_v50 = vadd.f32 %v3718_v49, %v3720_v63 }
 0x33b   :  { %v1568_v5 = vadd.f32 %v1553_v58, %v1552_v7 }
 0x33e   :  { %v1488_v51 = vpop.f32.mrf.mxu2 }
 0x33f   :  { %v3722_v48 = vadd.f32 %v1488_v51, %v1398_v11  ;;  %v3753_v51 = vpop.permute.xlu2 %1610 }
 0x341   :  { %v1554_v1 = vmul.f32 %v3722_v48, %v3722_v48  ;;  %v1531_v44 = vadd.f32 %v1530_v50, %v3722_v48  ;;  %v3773_v50 = vpop.permute.xlu1 %1620 }
 0x343   :  { %v1569_v19 = vadd.f32 %v1568_v5, %v1554_v1  ;;  %v3775_v1 = vpop.permute.xlu0 %1615 }
 0x346   :  { %v1491_v36 = vpop.f32.mrf.mxu2 }
 0x347   :  { %v3726_v54 = vadd.f32 %v1491_v36, %v1403_v2 }
 0x349   :  { %v1555_v16 = vmul.f32 %v3726_v54, %v3726_v54  ;;  %v1532_v26 = vadd.f32 %v1531_v44, %v3726_v54 }
 0x34b   :  { %v1570_v13 = vadd.f32 %v1569_v19, %v1555_v16  ;;  %v3780_v16 = vpop.permute.xlu2 %1625 }
 0x34e   :  { %v1494_v9 = vpop.f32.mrf.mxu2 }
 0x34f   :  { %v3734_v53 = vadd.f32 %v1494_v9, %v1408_v43 }
 0x351   :  { %v1556_v29 = vmul.f32 %v3734_v53, %v3734_v53  ;;  %v1533_v57 = vadd.f32 %v1532_v26, %v3734_v53 }
 0x353   :  { %v1571_v36 = vadd.f32 %v1570_v13, %v1556_v29  ;;  %v3787_v13 = vadd.f32 %v1521_v12, %v1453_v8 }
 0x356   :  { %v1497_v32 = vpop.f32.mrf.mxu2 }
 0x357   :  { %v3739_v15 = vadd.f32 %v1497_v32, %v1413_v6 }
 0x359   :  { %v1557_v35 = vmul.f32 %v3739_v15, %v3739_v15  ;;  %v1534_v59 = vadd.f32 %v1533_v57, %v3739_v15 }
 0x35b   :  { %v1572_v43 = vadd.f32 %v1571_v36, %v1557_v35 }
 0x35e   :  { %v1500_v25 = vpop.f32.mrf.mxu2 }
 0x35f   :  { %v3744_v33 = vadd.f32 %v1500_v25, %v1418_v14 }
 0x361   :  { %v1558_v52 = vmul.f32 %v3744_v33, %v3744_v33  ;;  %v1535_v2 = vadd.f32 %v1534_v59, %v3744_v33 }
 0x363   :  { %v1573_v14 = vadd.f32 %v1572_v43, %v1558_v52 }
 0x366   :  { %v1503_v22 = vpop.f32.mrf.mxu2 }
 0x367   :  { %v3751_v62 = vadd.f32 %v1503_v22, %v1423_v17  ;;  %v1524_v17 = vpop.f32.mrf.mxu3 }
 0x369   :  { %v1559_v6 = vmul.f32 %v3751_v62, %v3751_v62  ;;  %v1536_v25 = vadd.f32 %v1535_v2, %v3751_v62  ;;  %v3802_v2 = vpop.permute.xlu1 %1635 }
 0x36e   :  { %v1506_v24 = vpop.f32.mrf.mxu2 }
 0x36f   :  { %v3758_v11 = vadd.f32 %v1506_v24, %v1428_v31  ;;  %v1574_v31 = vadd.f32 %v1573_v14, %v1559_v6  ;;  %v1527_v59 = vpop.f32.mrf.mxu3  ;;  %v3804_v6 = vpop.permute.xlu0 %1630 }
 0x370   :  { %v3799_v8 = vadd.f32 %v1527_v59, %v1463_v46 }
 0x371   :  { %v1560_v22 = vmul.f32 %v3758_v11, %v3758_v11  ;;  %v1537_v24 = vadd.f32 %v1536_v25, %v3758_v11  ;;  %v3809_v25 = vpop.permute.xlu2 %1640 }
 0x376   :  { %v1509_v34 = vpop.f32.mrf.mxu2 }
 0x377   :  { %v3763_v32 = vadd.f32 %v1509_v34, %v1433_v30  ;;  %v1575_v30 = vadd.f32 %v1574_v31, %v1560_v22  ;;  %v1567_v22 = vmul.f32 %v3799_v8, %v3799_v8 }
 0x379   :  { %v1561_v7 = vmul.f32 %v3763_v32, %v3763_v32  ;;  %v1538_v34 = vadd.f32 %v1537_v24, %v3763_v32 }
 0x37b   :  { %v1576_v19 = vadd.f32 %v1575_v30, %v1561_v7 }
 0x37e   :  { %v1512_v9 = vpop.f32.mrf.mxu2 }
 0x37f   :  { %v3768_v58 = vadd.f32 %v1512_v9, %v1438_v37  ;;  %v3782_v37 = vadd.f32 %v1518_v23, %v1448_v20  ;;  %v3794_v9 = vadd.f32 %v1524_v17, %v1458_v4 }
 0x381   :  { %v1562_v5 = vmul.f32 %v3768_v58, %v3768_v58  ;;  %v1539_v26 = vadd.f32 %v1538_v34, %v3768_v58  ;;  %v1564_v52 = vmul.f32 %v3782_v37, %v3782_v37  ;;  %v1566_v14 = vmul.f32 %v3794_v9, %v3794_v9 }
 0x383   :  { %v1577_v57 = vadd.f32 %v1576_v19, %v1562_v5  ;;  %v3814_v19 = vpop.permute.xlu1 %1650 }
 0x386   :  { %v1515_v44 = vpop.f32.mrf.mxu2 }
 0x387   :  { %v3785_v29 = vadd.f32 %v1515_v44, %v1443_v42  ;;  %v1565_v42 = vmul.f32 %v3787_v13, %v3787_v13 }
 0x389   :  { %v1540_v35 = vadd.f32 %v1539_v26, %v3785_v29  ;;  %v1563_v36 = vmul.f32 %v3785_v29, %v3785_v29  ;;  %v3816_v26 = vpop.permute.xlu0 %1645 }
 0x38b   :  { %v1541_v23 = vadd.f32 %v1540_v35, %v3782_v37  ;;  %v1578_v20 = vadd.f32 %v1577_v57, %v1563_v36  ;;  %v3818_v36 = vpop.permute.xlu2 %1655 }
 0x38d   :  { %v1542_v12 = vadd.f32 %v1541_v23, %v3787_v13  ;;  %v1579_v43 = vadd.f32 %v1578_v20, %v1564_v52 }
 0x38f   :  { %v1543_v4 = vadd.f32 %v1542_v12, %v3794_v9  ;;  %v1580_v17 = vadd.f32 %v1579_v43, %v1565_v42 }
 0x391   :  { %v1544_v46 = vadd.f32 %v1543_v4, %v3799_v8  ;;  %v1581_v31 = vadd.f32 %v1580_v17, %v1566_v14  ;;  %v3824_v4 = vpop.permute.xlu1 %1665  ;;  %v3826_v17 = vpop.permute.xlu0 %1660 }
 0x393   :  { %v1545_v24 = vrot.slane %v1544_v46, 4  ;;  %v1582_v7 = vadd.f32 %v1581_v31, %v1567_v22 }
 0x395   :  { %v1546_v30 = vadd.f32 %v1545_v24, %v1544_v46  ;;  %v1583_v34 = vrot.slane %v1582_v7, 4  ;;  %v3828_v46 = vpop.permute.xlu2 %1670 }
 0x397   :  { %v1547_v5 = vrot.slane %v1546_v30, 2  ;;  %v1584_v44 = vadd.f32 %v1583_v34, %v1582_v7 }
 0x399   :  { %v1548_v57 = vadd.f32 %v1547_v5, %v1546_v30  ;;  %v1585_v35 = vrot.slane %v1584_v44, 2  ;;  %v1718_v7 = vpop.permute.xlu1 %1717  ;;  %v3830_v30 = vpop.permute.xlu0 %1675 }
 0x39b   :  { %v1549_v59 = vrot.slane %v1548_v57, 1  ;;  %v1586_v52 = vadd.f32 %v1585_v35, %v1584_v44 }
 0x39d   :  { %v1550_v23 = vadd.f32 %v1549_v59, %v1548_v57  ;;  %v1587_v20 = vrot.slane %v1586_v52, 1  ;;  %v1723_v5 = vpop.permute.xlu2 %1722 }
 0x39f   :  { %v3820_v42 = vmul.f32 0.03125, %v1550_v23  ;;  %v1588_v12 = vadd.f32 %v1587_v20, %v1586_v52 }
 0x3a1   :  { %v1589_v43 = vmul.f32 0.03125, %v1588_v12  ;;  %v1590_v14 = vmul.f32 %v3820_v42, %v3820_v42  ;;  %v1733_v59 = vpop.permute.xlu1 %1732  ;;  %v1728_v52 = vpop.permute.xlu0 %1727 }
 0x3a3   :  { %v1591_v22 = vsub.f32 %v1589_v43, %v1590_v14 }
 0x3a5   :  { %v1592_v31 = vadd.f32 1e-05, %v1591_v22  ;;  %v1738_v23 = vpop.permute.xlu2 %1737 }
 0x3a7   :  { %2223 = vrsqrt.f32 %v1592_v31  ;;  %vm1599_vm7 = vweird.f32 %v1592_v31 }
 0x3a9   :  { %v3834_v43 = vpop.permute.xlu1 %1747  ;;  %v1743_v14 = vpop.permute.xlu0 %1742 }
 0x3ad   :  { %v2224_v24 = vpop.eup %2223 }
 0x3ae   :  { %v1594_v34 = vmul.f32 %v2224_v24, %v1592_v31  ;;  %vm1600_vm6 = vweird.f32 %v2224_v24 }
 0x3af   :  { %vm1601_vm8 = vmor %vm1599_vm7, %vm1600_vm6 }
 0x3b0   :  { %v1595_v44 = vmul.f32 %v2224_v24, %v1594_v34 }
 0x3b1   :  { %v3853_v0 = vpop.permute.xlu0 %1757 }
 0x3b2   :  { %v1596_v57 = vmul.f32 0.5, %v1595_v44  ;;  %v3840_v44 = vpop.permute.xlu2 %1752 }
 0x3b4   :  { %v1597_v35 = vsub.f32 1.5, %v1596_v57 }
 0x3b6   :  { %v1598_v20 = vmul.f32 %v2224_v24, %v1597_v35 }
 0x3b8   :  { %v3832_v12 = vsel %vm1601_vm8, %v2224_v24, %v1598_v20 }
 0x3b9   :  { %v1683_v22 = vmul.f32 %v3746_v56, %v3832_v12  ;;  %v1684_v34 = vmul.f32 %v3753_v51, %v3832_v12  ;;  %v1685_v57 = vmul.f32 %v3775_v1, %v3832_v12  ;;  %v1686_v24 = vmul.f32 %v3773_v50, %v3832_v12  ;;  %v3851_v51 = vpop.permute.xlu1 %1762 }
 0x3ba   :  { %v1687_v20 = vmul.f32 %v3780_v16, %v3832_v12  ;;  %v1688_v1 = vmul.f32 %v3804_v6, %v3832_v12  ;;  %v1689_v16 = vmul.f32 %v3802_v2, %v3832_v12  ;;  %v1690_v6 = vmul.f32 %v3809_v25, %v3832_v12 }
 0x3bb   :  { %v1699_v35 = vmul.f32 %v1683_v22, %v3820_v42  ;;  %v1700_v31 = vmul.f32 %v1684_v34, %v3820_v42  ;;  %v1701_v56 = vmul.f32 %v1685_v57, %v3820_v42  ;;  %v1702_v21 = vmul.f32 %v1686_v24, %v3820_v42 }
 0x3bc   :  { %v1811_v60 = vmul.f32 %v1683_v22, %v3720_v63  ;;  %v1812_v50 = vmul.f32 %v1684_v34, %v3718_v49  ;;  %v1703_v40 = vmul.f32 %v1687_v20, %v3820_v42  ;;  %v1704_v28 = vmul.f32 %v1688_v1, %v3820_v42 }
 0x3bd   :  { %v1795_v41 = vsub.f32 %v1718_v7, %v1699_v35  ;;  %v1796_v45 = vsub.f32 %v1723_v5, %v1700_v31  ;;  %v3863_v7 = vpop.permute.xlu2 %1767  ;;  %v1797_v5 = vsub.f32 %v1728_v52, %v1701_v56  ;;  %v1798_v63 = vsub.f32 %v1733_v59, %v1702_v21  ;;  %v3896_v56 = vpop.permute.xlu0 %1772 }
 0x3be   :  { %v1813_v49 = vmul.f32 %v1685_v57, %v3722_v48  ;;  %v1691_v2 = vmul.f32 %v3816_v26, %v3832_v12  ;;  %v1705_v22 = vmul.f32 %v1689_v16, %v3820_v42  ;;  %v1799_v34 = vsub.f32 %v1738_v23, %v1703_v40 }
 0x3bf   :  { %v3865_v35 = vadd.f32 %v1811_v60, %v1795_v41  ;;  %v3867_v31 = vadd.f32 %v1812_v50, %v1796_v45  ;;  %v1814_v52 = vmul.f32 %v1686_v24, %v3726_v54  ;;  %v1692_v25 = vmul.f32 %v3814_v19, %v3832_v12 }
 0x3c0   :  { %v3877_v41 = vadd.f32 %v1813_v49, %v1797_v5  ;;  %v1693_v21 = vmul.f32 %v3818_v36, %v3832_v12  ;;  %v1706_v48 = vmul.f32 %v1690_v6, %v3820_v42  ;;  %v1800_v26 = vsub.f32 %v1743_v14, %v1704_v28 }
 0x3c1   :  { %v1859_v45 = vmin.f32 %v3865_v35, 0.0  ;;  %v1860_v60 = vmin.f32 %v3867_v31, 0.0  ;;  %v1815_v59 = vmul.f32 %v1687_v20, %v3734_v53  ;;  %v3887_v40 = vadd.f32 %v1814_v52, %v1798_v63  ;;  %v3894_v19 = vpop.permute.xlu1 %1777 }
 0x3c2   :  { %v1694_v54 = vmul.f32 %v3826_v17, %v3832_v12  ;;  %v1707_v23 = vmul.f32 %v1691_v2, %v3820_v42  ;;  %v1801_v57 = vsub.f32 %v3834_v43, %v1705_v22  ;;  %v1816_v24 = vmul.f32 %v1688_v1, %v3739_v15 }
 0x3c3   :  { %v3898_v36 = vadd.f32 %v1815_v59, %v1799_v34  ;;  %v1861_v28 = vmin.f32 %v3877_v41, 0.0  ;;  %v1875_v53 = vmul.f32 1.442695, %v1859_v45  ;;  %v1877_v14 = vmul.f32 1.442695, %v1860_v60 }
 0x3c4   :  { %v1695_v20 = vmul.f32 %v3824_v4, %v3832_v12  ;;  %v1696_v17 = vmul.f32 %v3828_v46, %v3832_v12  ;;  %v1697_v43 = vmul.f32 %v3830_v30, %v3832_v12  ;;  %v1708_v15 = vmul.f32 %v1692_v25, %v3820_v42 }
 0x3c5   :  { %v1681_v1 = vpop.permute.xlu2 %1680  ;;  %v1802_v50 = vsub.f32 %v3840_v44, %v1706_v48  ;;  %v1817_v5 = vmul.f32 %v1689_v16, %v3744_v33  ;;  %v3910_v63 = vadd.f32 %v1816_v24, %v1800_v26  ;;  %v1862_v49 = vmin.f32 %v3887_v40, 0.0 }
 0x3c6   :  { %v1709_v22 = vmul.f32 %v1693_v21, %v3820_v42  ;;  %v1803_v4 = vsub.f32 %v3853_v0, %v1707_v23  ;;  %v1818_v46 = vmul.f32 %v1690_v6, %v3751_v62  ;;  %2225 = vpow2.f32 %v1875_v53 }
 0x3c7   :  { %v3916_v34 = vadd.f32 %v1817_v5, %v1801_v57  ;;  %v1863_v30 = vmin.f32 %v3898_v36, 0.0  ;;  %2227 = vpow2.f32 %v1877_v14  ;;  %v1879_v52 = vmul.f32 1.442695, %v1861_v28 }
 0x3c8   :  { %v1698_v44 = vmul.f32 %v1681_v1, %v3832_v12  ;;  %v1710_v33 = vmul.f32 %v1694_v54, %v3820_v42  ;;  %v1711_v16 = vmul.f32 %v1695_v20, %v3820_v42  ;;  %v1804_v45 = vsub.f32 %v3851_v51, %v1708_v15  ;;  %v1783_v15 = vpop.permute.xlu0 %1782 }
 0x3c9   :  { %v1819_v60 = vmul.f32 %v1691_v2, %v3758_v11  ;;  %v3924_v0 = vadd.f32 %v1818_v46, %v1802_v50  ;;  %v1864_v62 = vmin.f32 %v3910_v63, 0.0  ;;  %v1881_v6 = vmul.f32 1.442695, %v1862_v49  ;;  %v1788_v14 = vpop.permute.xlu1 %1787 }
 0x3ca   :  { %v1712_v48 = vmul.f32 %v1696_v17, %v3820_v42  ;;  %v1713_v26 = vmul.f32 %v1697_v43, %v3820_v42  ;;  %v1805_v59 = vsub.f32 %v3863_v7, %v1709_v22  ;;  %v1820_v12 = vmul.f32 %v1692_v25, %v3763_v32 }
 0x3cb   :  { %v3931_v23 = vadd.f32 %v1819_v60, %v1803_v4  ;;  %v1865_v57 = vmin.f32 %v3916_v34, 0.0  ;;  %2229 = vpow2.f32 %v1879_v52  ;;  %v1883_v51 = vmul.f32 1.442695, %v1863_v30 }
 0x3cc   :  { %v2226_v11 = vpop.eup %2225  ;;  %v1714_v2 = vmul.f32 %v1698_v44, %v3820_v42  ;;  %v1806_v24 = vsub.f32 %v3896_v56, %v1710_v33  ;;  %v1821_v28 = vmul.f32 %v1693_v21, %v3768_v58  ;;  %v3937_v1 = vadd.f32 %v1820_v12, %v1804_v45 }
 0x3cd   :  { %v2228_v53 = vpop.eup %2227  ;;  %v1866_v32 = vmin.f32 %v3924_v0, 0.0  ;;  %2231 = vpow2.f32 %v1881_v6  ;;  %v1885_v7 = vmul.f32 1.442695, %v1864_v62  ;;  %v1807_v25 = vsub.f32 %v3894_v19, %v1711_v16  ;;  %v1793_v42 = vpop.permute.xlu2 %1792 }
 0x3ce   :  { %v1808_v50 = vsub.f32 %v1783_v15, %v1712_v48  ;;  %v1809_v5 = vsub.f32 %v1788_v14, %v1713_v26  ;;  %v1822_v49 = vmul.f32 %v1694_v54, %v3785_v29  ;;  %v3942_v22 = vadd.f32 %v1821_v28, %v1805_v59  ;;  %v1956_v28 = vld [vmem:[%s4086_s13 + $0x8] sm:$0xff] }
 0x3cf   :  { %v1867_v58 = vmin.f32 %v3931_v23, 0.0  ;;  %2233 = vpow2.f32 %v1883_v51  ;;  %v1887_v21 = vmul.f32 1.442695, %v1865_v57  ;;  %v1810_v56 = vsub.f32 %v1793_v42, %v1714_v2 }
 0x3d0   :  { %v1823_v4 = vmul.f32 %v1695_v20, %v3782_v37  ;;  %v2087_v46 = vadd.f32 -1.0, %v2226_v11  ;;  %v2088_v30 = vadd.f32 -1.0, %v2228_v53  ;;  %v3946_v33 = vadd.f32 %v1822_v49, %v1806_v24  ;;  %v1955_v24 = vld [vmem:[%s4086_s13] sm:$0xff] }
 0x3d1   :  { %v2230_v52 = vpop.eup %2229  ;;  %v1868_v19 = vmin.f32 %v3937_v1, 0.0  ;;  %2235 = vpow2.f32 %v1885_v7  ;;  %v1889_v16 = vmul.f32 1.442695, %v1866_v32  ;;  %v1824_v29 = vmul.f32 %v1696_v17, %v3787_v13 }
 0x3d2   :  { %v1825_v54 = vmul.f32 %v1697_v43, %v3794_v9  ;;  %v3951_v45 = vadd.f32 %v1823_v4, %v1807_v25  ;;  %vm1843_vm9 = vcmp.gt.f32.partialorder %v3865_v35, 0.0  ;;  %vm1844_vm10 = vcmp.gt.f32.partialorder %v3867_v31, 0.0 }
 0x3d3   :  { %v2232_v60 = vpop.eup %2231  ;;  %v1869_v37 = vmin.f32 %v3942_v22, 0.0  ;;  %2237 = vpow2.f32 %v1887_v21  ;;  %v1891_v20 = vmul.f32 1.442695, %v1867_v58  ;;  %v1826_v62 = vmul.f32 %v1698_v44, %v3799_v8  ;;  %v1957_v21 = vld [vmem:[%s4086_s13 + $0x10] sm:$0xff] }
 0x3d4   :  { %v2089_v6 = vadd.f32 -1.0, %v2230_v52  ;;  %v1923_v48 = vsel %vm1843_vm9, %v3865_v35, %v2087_v46  ;;  %v1924_v13 = vsel %vm1844_vm10, %v3867_v31, %v2088_v30  ;;  %v3959_v9 = vadd.f32 %v1824_v29, %v1808_v50 }
 0x3d5   :  { %v2234_v17 = vpop.eup %2233  ;;  %v1870_v43 = vmin.f32 %v3946_v33, 0.0  ;;  %2239 = vpow2.f32 %v1889_v16  ;;  %v1893_v26 = vmul.f32 1.442695, %v1868_v19  ;;  %v3962_v59 = vadd.f32 %v1825_v54, %v1809_v5 }
 0x3d6   :  { %vm1845_vm11 = vcmp.gt.f32.partialorder %v3877_v41, 0.0  ;;  %v1871_v12 = vmin.f32 %v3951_v45, 0.0  ;;  %v2090_v57 = vadd.f32 -1.0, %v2232_v60  ;;  %2241 = vpow2.f32 %v1891_v20 }
 0x3d7   :  { %v2236_v8 = vpop.eup %2235  ;;  %v1895_v44 = vmul.f32 1.442695, %v1869_v37  ;;  %v1939_v35 = vadd.f32 %v1923_v48, %v3666_v55  ;;  %v1940_v31 = vadd.f32 %v1924_v13, %v3661_v47  ;;  %v3968_v51 = vadd.f32 %v1826_v62, %v1810_v56  ;;  %v1960_v13 = vld [vmem:[%s4086_s13 + $0x28] sm:$0xff] }
 0x3d8   :  { %vm1846_vm12 = vcmp.gt.f32.partialorder %v3887_v40, 0.0  ;;  %v2091_v11 = vadd.f32 -1.0, %v2234_v17  ;;  %v1925_v2 = vsel %vm1845_vm11, %v3877_v41, %v2089_v6  ;;  %vm1847_vm13 = vcmp.gt.f32.partialorder %v3898_v36, 0.0 }
 0x3d9   :  { %v2238_v53 = vpop.eup %2237  ;;  %v1872_v47 = vmin.f32 %v3959_v9, 0.0  ;;  %2243 = vpow2.f32 %v1893_v26  ;;  %v1897_v55 = vmul.f32 1.442695, %v1870_v43  ;;  %v1873_v14 = vmin.f32 %v3962_v59, 0.0 }
 0x3da   :  { %v1899_v15 = vmul.f32 1.442695, %v1871_v12  ;;  %v2092_v32 = vadd.f32 -1.0, %v2236_v8  ;;  %v1926_v41 = vsel %vm1846_vm12, %v3887_v40, %v2090_v57  ;;  %2245 = vpow2.f32 %v1895_v44  ;;  %v1961_v57 = vld [vmem:[%s4086_s13 + $0x30] sm:$0xff] }
 0x3db   :  { %v2240_v7 = vpop.eup %2239  ;;  %v1941_v25 = vadd.f32 %v1925_v2, %v3656_v10  ;;  %v1971_v50 = vmul.f32 %v1955_v24, %v1939_v35  ;;  %v1972_v5 = vmul.f32 %v1956_v28, %v1940_v31  ;;  %v1874_v49 = vmin.f32 %v3968_v51, 0.0 }
 0x3dc   :  { %v2093_v42 = vadd.f32 -1.0, %v2238_v53  ;;  %v1927_v58 = vsel %vm1847_vm13, %v3898_v36, %v2091_v11  ;;  %v2242_v56 = vpop.eup %2241  ;;  %vm1848_vm14 = vcmp.gt.f32.partialorder %v3910_v63, 0.0  ;;  %2247 = vpow2.f32 %v1897_v55  ;;  %v1958_v36 = vld [vmem:[%s4086_s13 + $0x18] sm:$0xff] }
 0x3dd   :  { %v1901_v40 = vmul.f32 1.442695, %v1872_v47  ;;  %v1942_v4 = vadd.f32 %v1926_v41, %v3651_v27  ;;  %vm1849_vm15 = vcmp.gt.f32.partialorder %v3916_v34, 0.0  ;;  %v1903_v10 = vmul.f32 1.442695, %v1873_v14  ;;  %v1962_v11 = vld [vmem:[%s4086_s13 + $0x38] sm:$0xff] }
 0x3de   :  { %v2094_v46 = vadd.f32 -1.0, %v2240_v7  ;;  %v1928_v30 = vsel %vm1848_vm14, %v3910_v63, %v2092_v32  ;;  %2249 = vpow2.f32 %v1899_v15  ;;  %v1943_v19 = vadd.f32 %v1927_v58, %v3646_v18  ;;  %v1959_v63 = vld [vmem:[%s4086_s13 + $0x20] sm:$0xff] }
 0x3df   :  { %v2244_v52 = vpop.eup %2243  ;;  %v1973_v16 = vmul.f32 %v1957_v21, %v1941_v25  ;;  %v1987_v29 = vadd.f32 %v1972_v5, %v1971_v50  ;;  %vm1850_vm0 = vcmp.gt.f32.partialorder %v3924_v0, 0.0  ;;  %v1905_v54 = vmul.f32 1.442695, %v1874_v49  ;;  %v1965_v21 = vld [vmem:[%s4086_s13 + $0x50] sm:$0xff] }
 0x3e0   :  { %v2095_v27 = vadd.f32 -1.0, %v2242_v56  ;;  %v1929_v60 = vsel %vm1849_vm15, %v3916_v34, %v2093_v42  ;;  %v2246_v37 = vpop.eup %2245  ;;  %2251 = vpow2.f32 %v1901_v40  ;;  %v1944_v20 = vadd.f32 %v1928_v30, %v3639_v3  ;;  %v1966_v30 = vld [vmem:[%s4086_s13 + $0x58] sm:$0xff] }
 0x3e1   :  { %v1974_v62 = vmul.f32 %v1958_v36, %v1942_v4  ;;  %v1988_v6 = vadd.f32 %v1987_v29, %v1973_v16  ;;  %vm1851_vm1 = vcmp.gt.f32.partialorder %v3931_v23, 0.0  ;;  %v2096_v18 = vadd.f32 -1.0, %v2244_v52  ;;  %v4134_v16 = vld [vmem:[#allocation2_spill] sm:$0xff] }
 0x3e2   :  { %v1930_v48 = vsel %vm1850_vm0, %v3924_v0, %v2094_v46  ;;  %v2248_v34 = vpop.eup %2247  ;;  %2253 = vpow2.f32 %v1903_v10  ;;  %v1945_v17 = vadd.f32 %v1929_v60, %v3630_v39  ;;  %v1975_v43 = vmul.f32 %v1959_v63, %v1943_v19 }
 0x3e3   :  { %v1989_v26 = vadd.f32 %v1988_v6, %v1974_v62  ;;  %vm1852_vm2 = vcmp.gt.f32.partialorder %v3937_v1, 0.0  ;;  %v2097_v3 = vadd.f32 -1.0, %v2246_v37  ;;  %v1931_v12 = vsel %vm1851_vm1, %v3931_v23, %v2095_v27  ;;  %v1967_v27 = vld [vmem:[%s4086_s13 + $0x60] sm:$0xff]  ;;  %v1968_v62 = vld [vmem:[%s4086_s13 + $0x68] sm:$0xff] }
 0x3e4   :  { %v2250_v0 = vpop.eup %2249  ;;  %2255 = vpow2.f32 %v1905_v54  ;;  %v1946_v8 = vadd.f32 %v1930_v48, %v3623_v38  ;;  %v1976_v44 = vmul.f32 %v1960_v13, %v1944_v20  ;;  %v2098_v31 = vadd.f32 -1.0, %v2248_v34  ;;  %v1963_v38 = vld [vmem:[%s4086_s13 + $0x40] sm:$0xff]  ;;  %v4136_v6 = vld [vmem:[#allocation11_spill] sm:$0xff]  ;;  %v1969_v34 = vld [vmem:[%s4086_s13 + $0x70] sm:$0xff] }
 0x3e5   :  { %v1990_v35 = vadd.f32 %v1989_v26, %v1975_v43  ;;  %v1932_v39 = vsel %vm1852_vm2, %v3937_v1, %v2096_v18  ;;  %vm1853_vm3 = vcmp.gt.f32.partialorder %v3942_v22, 0.0  ;;  %v1947_v23 = vadd.f32 %v1931_v12, %v3608_v61  ;;  %v4130_v1 = vld [vmem:[#allocation16_spill] sm:$0xff]  ;;  %v1964_v61 = vld [vmem:[%s4086_s13 + $0x48] sm:$0xff] }
 0x3e6   :  { %v2252_v2 = vpop.eup %2251  ;;  %v1977_v24 = vmul.f32 %v1961_v57, %v1945_v17  ;;  %v2099_v53 = vadd.f32 -1.0, %v2250_v0  ;;  %v1933_v47 = vsel %vm1853_vm3, %v3942_v22, %v2097_v3  ;;  %vm1854_vm4 = vcmp.gt.f32.partialorder %v3946_v33, 0.0  ;;  %v4131_v22 = vld [vmem:[#allocation15_spill] sm:$0xff]  ;;  %v4137_v17 = vld [vmem:[#allocation10_spill] sm:$0xff] }
 0x3e7   :  { %v1991_v28 = vadd.f32 %v1990_v35, %v1976_v44  ;;  %v1948_v14 = vadd.f32 %v1932_v39, %v4130_v1  ;;  %v1978_v15 = vmul.f32 %v1962_v11, %v1946_v8  ;;  %v2100_v41 = vadd.f32 -1.0, %v2252_v2 }
 0x3e8   :  { %v2254_v55 = vpop.eup %2253  ;;  %v1934_v7 = vsel %vm1854_vm4, %v3946_v33, %v2098_v31  ;;  %vm1855_vm5 = vcmp.gt.f32.partialorder %v3951_v45, 0.0  ;;  %v1949_v50 = vadd.f32 %v1933_v47, %v4131_v22  ;;  %v1979_v5 = vmul.f32 %v1963_v38, %v1947_v23  ;;  %v4132_v33 = vld [vmem:[#allocation14_spill] sm:$0xff] }
 0x3e9   :  { %v1992_v32 = vadd.f32 %v1991_v28, %v1977_v24  ;;  %v2101_v42 = vadd.f32 -1.0, %v2254_v55  ;;  %v1935_v58 = vsel %vm1855_vm5, %v3951_v45, %v2099_v53  ;;  %vm1856_vm6 = vcmp.gt.f32.partialorder %v3959_v9, 0.0  ;;  %v4133_v45 = vld [vmem:[#allocation13_spill] sm:$0xff]  ;;  %v2008_v47 = vld [vmem:[%s4087_s14] sm:$0x1] }
 0x3ea   :  { %v2256_v25 = vpop.eup %2255  ;;  %v1950_v56 = vadd.f32 %v1934_v7, %v4132_v33  ;;  %v1980_v40 = vmul.f32 %v1964_v61, %v1948_v14  ;;  %v1936_v46 = vsel %vm1856_vm6, %v3959_v9, %v2100_v41  ;;  %vm1857_vm7 = vcmp.gt.f32.partialorder %v3962_v59, 0.0  ;;  %v4135_v9 = vld [vmem:[#allocation12_spill] sm:$0xff]  ;;  %v2048_v55 = vld [vmem:[%s4088_s15] sm:$0x1] }
 0x3eb   :  { %v1993_v49 = vadd.f32 %v1992_v32, %v1978_v15  ;;  %v2102_v10 = vadd.f32 -1.0, %v2256_v25  ;;  %v1951_v36 = vadd.f32 %v1935_v58, %v4133_v45  ;;  %v1981_v52 = vmul.f32 %v1965_v21, %v1949_v50 }
 0x3ec   :  { %v2041_v29 = vrot.slane %v4134_v16, 4  ;;  %v1937_v54 = vsel %vm1857_vm7, %v3962_v59, %v2101_v42  ;;  %vm1858_vm8 = vcmp.gt.f32.partialorder %v3968_v51, 0.0  ;;  %v1952_v60 = vadd.f32 %v1936_v46, %v4135_v9 }
 0x3ed   :  { %v1994_v4 = vadd.f32 %v1993_v49, %v1979_v5  ;;  %v1982_v63 = vmul.f32 %v1966_v30, %v1950_v56  ;;  %v1938_v20 = vsel %vm1858_vm8, %v3968_v51, %v2102_v10  ;;  %v1953_v18 = vadd.f32 %v1937_v54, %v4136_v6  ;;  %v1970_v51 = vld [vmem:[%s4086_s13 + $0x78] sm:$0xff] }
 0x3ee   :  { %v1983_v48 = vmul.f32 %v1967_v27, %v1951_v36  ;;  %v2042_v13 = vadd.f32 %v2041_v29, %v4134_v16  ;;  %v1954_v43 = vadd.f32 %v1938_v20, %v4137_v17  ;;  %v1984_v26 = vmul.f32 %v1968_v62, %v1952_v60 }
 0x3ef   :  { %v1995_v19 = vadd.f32 %v1994_v4, %v1980_v40  ;;  %v1985_v12 = vmul.f32 %v1969_v34, %v1953_v18 }
 0x3f0   :  { %v2043_v0 = vrot.slane %v2042_v13, 2  ;;  %v1986_v8 = vmul.f32 %v1970_v51, %v1954_v43 }
 0x3f1   :  { %v1996_v37 = vadd.f32 %v1995_v19, %v1981_v52 }
 0x3f2   :  { %v2044_v31 = vadd.f32 %v2043_v0, %v2042_v13 }
 0x3f3   :  { %v1997_v59 = vadd.f32 %v1996_v37, %v1982_v63 }
 0x3f4   :  { %v2045_v2 = vrot.slane %v2044_v31, 1 }
 0x3f5   :  { %v1998_v3 = vadd.f32 %v1997_v59, %v1983_v48 }
 0x3f6   :  { %v2046_v28 = vadd.f32 %v2045_v2, %v2044_v31 }
 0x3f7   :  { %v1999_v57 = vadd.f32 %v1998_v3, %v1984_v26 }
 0x3f8   :  { %vm2047_vm9 = vcmp.eq.f32.partialorder %v2046_v28, 0.0 }
 0x3f9   :  { %v2000_v44 = vadd.f32 %v1999_v57, %v1985_v12 }
 0x3fb   :  { %v2001_v35 = vadd.f32 %v2000_v44, %v1986_v8 }
 0x3fd   :  { %v2002_v39 = vrot.slane %v2001_v35, 4 }
 0x3ff   :  { %v2003_v11 = vadd.f32 %v2002_v39, %v2001_v35 }
 0x401   :  { %v2004_v23 = vrot.slane %v2003_v11, 2 }
 0x403   :  { %v2005_v24 = vadd.f32 %v2004_v23, %v2003_v11 }
 0x405   :  { %v2006_v53 = vrot.slane %v2005_v24, 1 }
 0x407   :  { %v2007_v38 = vadd.f32 %v2006_v53, %v2005_v24 }
 0x409   :  { %v2009_v1 = vadd.f32 %v2008_v47, %v2007_v38 }
 0x40b   :  { %v2049_v14 = vsel %vm2047_vm9, %v2048_v55, %v2009_v1 }
 0x40c   :  { %2050 = vst [vmem:[%s4089_s16] sm:$0x1] %v2049_v14 }

</bundles_post_ra>
